<compile_context>
chip_gen: v6e
topology: v6e:2x2x1
jax: 0.10.0
libtpu: 0.0.40
codegen_flags: <defaults>
</compile_context>

<pallas_src>
import functools

import jax
import jax.numpy as jnp
from jax.experimental import pallas as pl
from jax.experimental.pallas import tpu as pltpu

# ---- model dimensions (match FKNet defaults) --------------------------------
INPUT_SIZE = 12
HIDDEN1 = 8
LATENT_SIZE = 6
HIDDEN2_A = 512
HIDDEN2_B = 512
OUTPUT_SIZE = 12
LANE = 128  # lane-dense output slab width (one full vreg lane group)


def fknet_kernel(x_ref,
                 w1_ref, b1_ref,      # encoder Linear(12 -> 8)
                 w2_ref, b2_ref,      # encoder Linear(8 -> 6)
                 w3_ref, b3_ref,      # decoder Linear(6 -> 512)   (bf16 W)
                 w4_ref, b4_ref,      # decoder Linear(512 -> 512) (bf16 W)
                 w5_ref, b5_ref,      # decoder Linear(512 -> 12)  (bf16 W)
                 pred_ref, latent_ref):
    """Whole MLP forward for one batch tile; all weights live in VMEM."""
    x = x_ref[...]

    # ---- encoder (tiny K/N; MXU-pad dominated but negligible vs. 512x512) ----
    h1 = jnp.dot(x, w1_ref[...], preferred_element_type=jnp.float32) + b1_ref[...]
    h1 = jnp.maximum(h1, 0.0)                      # ReLU (dropout = identity, eval)

    lat = jnp.dot(h1, w2_ref[...], preferred_element_type=jnp.float32) + b2_ref[...]
    lat = jnp.maximum(lat, 0.0)                    # ReLU -> latent

    # ---- decoder: bf16 MXU operands, f32 accumulation, f32 elementwise ----
    d1 = jnp.dot(lat.astype(jnp.bfloat16), w3_ref[...],
                 preferred_element_type=jnp.float32) + b3_ref[...]
    d1 = jnp.maximum(d1, 0.0)

    d2 = jnp.dot(d1.astype(jnp.bfloat16), w4_ref[...],
                 preferred_element_type=jnp.float32) + b4_ref[...]
    d2 = jnp.maximum(d2, 0.0)

    pred = jnp.dot(d2.astype(jnp.bfloat16), w5_ref[...],
                   preferred_element_type=jnp.float32) + b5_ref[...]

    # Lane-dense (128-wide) unmasked stores; wrapper slices back to 12 / 6 cols.
    pred_ref[...] = jnp.pad(
        pred, ((0, 0), (0, LANE - OUTPUT_SIZE))).astype(pred_ref.dtype)
    latent_ref[...] = jnp.pad(
        lat, ((0, 0), (0, LANE - LATENT_SIZE))).astype(latent_ref.dtype)


@functools.partial(jax.jit, static_argnames=("tile_b",))
def fknet_forward(x, params, *, tile_b=512):
    """x: (B, INPUT_SIZE) float32.  Returns (pred, latent)."""
    B, F = x.shape
    assert F == INPUT_SIZE
    assert tile_b % 128 == 0, "keep batch tiles MXU-row aligned"

    w1, b1, w2, b2, w3, b3, w4, b4, w5, b5 = params
    # bf16 for the big decoder weights (dominant HBM bytes / MXU time).
    w3 = w3.astype(jnp.bfloat16)
    w4 = w4.astype(jnp.bfloat16)
    w5 = w5.astype(jnp.bfloat16)

    # Pad batch to a multiple of the tile so a large tile is always legal.
    num_tiles = pl.cdiv(B, tile_b)
    b_pad = num_tiles * tile_b
    if b_pad != B:
        x = jnp.pad(x, ((0, b_pad - B), (0, 0)))

    x_map = lambda i: (i, 0)
    w_map = lambda i: (0, 0)           # constant index -> weights DMA'd once
    full_spec = lambda arr: pl.BlockSpec(arr.shape, w_map)

    out_shapes = (
        jax.ShapeDtypeStruct((b_pad, LANE), jnp.float32),  # padded pred slab
        jax.ShapeDtypeStruct((b_pad, LANE), jnp.float32),  # padded latent slab
    )

    pred_pad, latent_pad = pl.pallas_call(
        fknet_kernel,
        out_shape=out_shapes,
        grid_spec=pltpu.PrefetchScalarGridSpec(
            num_scalar_prefetch=0,
            grid=(num_tiles,),
            in_specs=[
                pl.BlockSpec((tile_b, INPUT_SIZE), x_map),
                full_spec(w1), full_spec(b1),
                full_spec(w2), full_spec(b2),
                full_spec(w3), full_spec(b3),
                full_spec(w4), full_spec(b4),
                full_spec(w5), full_spec(b5),
            ],
            out_specs=[
                pl.BlockSpec((tile_b, LANE), x_map),
                pl.BlockSpec((tile_b, LANE), x_map),
            ],
        ),
        compiler_params=pltpu.CompilerParams(
            # Batch tiles are independent -> shard grid across TCs (v7x megacore).
            dimension_semantics=("parallel",),
        ),
    )(x, w1, b1, w2, b2, w3, b3, w4, b4, w5, b5)

    return pred_pad[:B, :OUTPUT_SIZE], latent_pad[:B, :LATENT_SIZE]


def init_params(key):
    """Deterministic init mimicking nn.Linear default (U[-1/sqrt(fan_in), +])."""
    dims = [
        (INPUT_SIZE, HIDDEN1),
        (HIDDEN1, LATENT_SIZE),
        (LATENT_SIZE, HIDDEN2_A),
        (HIDDEN2_A, HIDDEN2_B),
        (HIDDEN2_B, OUTPUT_SIZE),
    ]
    params = []
    for (fan_in, fan_out) in dims:
        key, kw, kb = jax.random.split(key, 3)
        bound = 1.0 / jnp.sqrt(jnp.float32(fan_in))
        w = jax.random.uniform(kw, (fan_in, fan_out), jnp.float32, -bound, bound)
        b = jax.random.uniform(kb, (1, fan_out), jnp.float32, -bound, bound)
        params.extend([w, b])
    return tuple(params)


def fknet_ref(x, params):
    """Pure-JAX f32 reference for validation."""
    w1, b1, w2, b2, w3, b3, w4, b4, w5, b5 = params
    h1 = jnp.maximum(x @ w1 + b1, 0.0)
    lat = jnp.maximum(h1 @ w2 + b2, 0.0)
    d1 = jnp.maximum(lat @ w3 + b3, 0.0)
    d2 = jnp.maximum(d1 @ w4 + b4, 0.0)
    pred = d2 @ w5 + b5
    return pred, lat


if __name__ == "__main__":
    key = jax.random.PRNGKey(0)
    key, kx = jax.random.split(key)

    # Small demo: B is intentionally NOT a tile multiple to exercise the
    # padding path, and tile_b=128 gives a 2-step (megacore-shardable) grid.
    B = 200
    x = jax.random.normal(kx, (B, INPUT_SIZE), jnp.float32)

    params = init_params(key)

    pred, latent = fknet_forward(x, params, tile_b=128)
    pred = jax.block_until_ready(pred)
    latent = jax.block_until_ready(latent)

    pred_ref, latent_ref = fknet_ref(x, params)

    assert pred.shape == (B, OUTPUT_SIZE)
    assert latent.shape == (B, LATENT_SIZE)
    # Encoder path is pure f32 -> tight; decoder uses bf16 MXU operands -> loose.
    assert jnp.allclose(latent, latent_ref, atol=1e-4, rtol=1e-4)
    assert jnp.allclose(pred, pred_ref, atol=5e-2, rtol=5e-2)

    print("KERNEL_OK")
</pallas_src>

<mosaic_0001>
module attributes {stable_mosaic.version = 11 : i64} {
  func.func @fknet_kernel(%arg0: i32, %arg1: memref<128x12xf32, #tpu.memory_space<vmem>>, %arg2: memref<12x8xf32, #tpu.memory_space<vmem>>, %arg3: memref<1x8xf32, #tpu.memory_space<vmem>>, %arg4: memref<8x6xf32, #tpu.memory_space<vmem>>, %arg5: memref<1x6xf32, #tpu.memory_space<vmem>>, %arg6: memref<6x512xbf16, #tpu.memory_space<vmem>>, %arg7: memref<1x512xf32, #tpu.memory_space<vmem>>, %arg8: memref<512x512xbf16, #tpu.memory_space<vmem>>, %arg9: memref<1x512xf32, #tpu.memory_space<vmem>>, %arg10: memref<512x12xbf16, #tpu.memory_space<vmem>>, %arg11: memref<1x12xf32, #tpu.memory_space<vmem>>, %arg12: memref<128x128xf32, #tpu.memory_space<vmem>>, %arg13: memref<128x128xf32, #tpu.memory_space<vmem>>) attributes {dimension_semantics = [#tpu.dimension_semantics<parallel>], iteration_bounds = array<i64: 2>, scalar_prefetch = 0 : i64, scratch_operands = 0 : i64, tpu.core_type = #tpu.core_type<tc>, window_params = [{transform_indices = @transform_0, window_bounds = array<i64: 128, 12>}, {pipeline_mode = #tpu.pipeline_mode<synchronous>, transform_indices = @transform_1, window_bounds = array<i64: 12, 8>}, {pipeline_mode = #tpu.pipeline_mode<synchronous>, transform_indices = @transform_2, window_bounds = array<i64: 1, 8>}, {pipeline_mode = #tpu.pipeline_mode<synchronous>, transform_indices = @transform_3, window_bounds = array<i64: 8, 6>}, {pipeline_mode = #tpu.pipeline_mode<synchronous>, transform_indices = @transform_4, window_bounds = array<i64: 1, 6>}, {pipeline_mode = #tpu.pipeline_mode<synchronous>, transform_indices = @transform_5, window_bounds = array<i64: 6, 512>}, {pipeline_mode = #tpu.pipeline_mode<synchronous>, transform_indices = @transform_6, window_bounds = array<i64: 1, 512>}, {pipeline_mode = #tpu.pipeline_mode<synchronous>, transform_indices = @transform_7, window_bounds = array<i64: 512, 512>}, {pipeline_mode = #tpu.pipeline_mode<synchronous>, transform_indices = @transform_8, window_bounds = array<i64: 1, 512>}, {pipeline_mode = #tpu.pipeline_mode<synchronous>, transform_indices = @transform_9, window_bounds = array<i64: 512, 12>}, {pipeline_mode = #tpu.pipeline_mode<synchronous>, transform_indices = @transform_10, window_bounds = array<i64: 1, 12>}, {transform_indices = @transform_11, window_bounds = array<i64: 128, 128>}, {transform_indices = @transform_12, window_bounds = array<i64: 128, 128>}]} {
    %c0 = arith.constant 0 : index
    %c0_0 = arith.constant 0 : index
    %0 = vector.load %arg1[%c0, %c0_0] : memref<128x12xf32, #tpu.memory_space<vmem>>, vector<128x12xf32>
    %c0_1 = arith.constant 0 : index
    %c0_2 = arith.constant 0 : index
    %1 = vector.load %arg2[%c0_1, %c0_2] : memref<12x8xf32, #tpu.memory_space<vmem>>, vector<12x8xf32>
    %cst = arith.constant dense<0.000000e+00> : vector<128x8xf32>
    %2 = tpu.matmul %0, %1, %cst {dimension_numbers = #tpu.dot_dimension_numbers<[1], [0], [0], [1], [0, 0, 1, 1], [], []>} : vector<128x12xf32>, vector<12x8xf32>, vector<128x8xf32> -> vector<128x8xf32>
    %c0_3 = arith.constant 0 : index
    %c0_4 = arith.constant 0 : index
    %3 = vector.load %arg3[%c0_3, %c0_4] : memref<1x8xf32, #tpu.memory_space<vmem>>, vector<1x8xf32>
    %4 = vector.broadcast %3 : vector<1x8xf32> to vector<128x8xf32>
    %5 = arith.addf %2, %4 : vector<128x8xf32>
    %cst_5 = arith.constant 0.000000e+00 : f32
    %6 = vector.broadcast %cst_5 : f32 to vector<128x8xf32>
    %7 = arith.maximumf %5, %6 : vector<128x8xf32>
    %c0_6 = arith.constant 0 : index
    %c0_7 = arith.constant 0 : index
    %8 = vector.load %arg4[%c0_6, %c0_7] : memref<8x6xf32, #tpu.memory_space<vmem>>, vector<8x6xf32>
    %cst_8 = arith.constant dense<0.000000e+00> : vector<128x6xf32>
    %9 = tpu.matmul %7, %8, %cst_8 {dimension_numbers = #tpu.dot_dimension_numbers<[1], [0], [0], [1], [0, 0, 1, 1], [], []>} : vector<128x8xf32>, vector<8x6xf32>, vector<128x6xf32> -> vector<128x6xf32>
    %c0_9 = arith.constant 0 : index
    %c0_10 = arith.constant 0 : index
    %10 = vector.load %arg5[%c0_9, %c0_10] : memref<1x6xf32, #tpu.memory_space<vmem>>, vector<1x6xf32>
    %11 = vector.broadcast %10 : vector<1x6xf32> to vector<128x6xf32>
    %12 = arith.addf %9, %11 : vector<128x6xf32>
    %cst_11 = arith.constant 0.000000e+00 : f32
    %13 = vector.broadcast %cst_11 : f32 to vector<128x6xf32>
    %14 = arith.maximumf %12, %13 : vector<128x6xf32>
    %15 = arith.truncf %14 : vector<128x6xf32> to vector<128x6xbf16>
    %c0_12 = arith.constant 0 : index
    %c0_13 = arith.constant 0 : index
    %16 = vector.load %arg6[%c0_12, %c0_13] : memref<6x512xbf16, #tpu.memory_space<vmem>>, vector<6x512xbf16>
    %cst_14 = arith.constant dense<0.000000e+00> : vector<128x512xf32>
    %17 = tpu.matmul %15, %16, %cst_14 {dimension_numbers = #tpu.dot_dimension_numbers<[1], [0], [0], [1], [0, 0, 1, 1], [], []>} : vector<128x6xbf16>, vector<6x512xbf16>, vector<128x512xf32> -> vector<128x512xf32>
    %c0_15 = arith.constant 0 : index
    %c0_16 = arith.constant 0 : index
    %18 = vector.load %arg7[%c0_15, %c0_16] : memref<1x512xf32, #tpu.memory_space<vmem>>, vector<1x512xf32>
    %19 = vector.broadcast %18 : vector<1x512xf32> to vector<128x512xf32>
    %20 = arith.addf %17, %19 : vector<128x512xf32>
    %cst_17 = arith.constant 0.000000e+00 : f32
    %21 = vector.broadcast %cst_17 : f32 to vector<128x512xf32>
    %22 = arith.maximumf %20, %21 : vector<128x512xf32>
    %23 = arith.truncf %22 : vector<128x512xf32> to vector<128x512xbf16>
    %c0_18 = arith.constant 0 : index
    %c0_19 = arith.constant 0 : index
    %24 = vector.load %arg8[%c0_18, %c0_19] : memref<512x512xbf16, #tpu.memory_space<vmem>>, vector<512x512xbf16>
    %cst_20 = arith.constant dense<0.000000e+00> : vector<128x512xf32>
    %25 = tpu.matmul %23, %24, %cst_20 {dimension_numbers = #tpu.dot_dimension_numbers<[1], [0], [0], [1], [0, 0, 1, 1], [], []>} : vector<128x512xbf16>, vector<512x512xbf16>, vector<128x512xf32> -> vector<128x512xf32>
    %c0_21 = arith.constant 0 : index
    %c0_22 = arith.constant 0 : index
    %26 = vector.load %arg9[%c0_21, %c0_22] : memref<1x512xf32, #tpu.memory_space<vmem>>, vector<1x512xf32>
    %27 = vector.broadcast %26 : vector<1x512xf32> to vector<128x512xf32>
    %28 = arith.addf %25, %27 : vector<128x512xf32>
    %cst_23 = arith.constant 0.000000e+00 : f32
    %29 = vector.broadcast %cst_23 : f32 to vector<128x512xf32>
    %30 = arith.maximumf %28, %29 : vector<128x512xf32>
    %31 = arith.truncf %30 : vector<128x512xf32> to vector<128x512xbf16>
    %c0_24 = arith.constant 0 : index
    %c0_25 = arith.constant 0 : index
    %32 = vector.load %arg10[%c0_24, %c0_25] : memref<512x12xbf16, #tpu.memory_space<vmem>>, vector<512x12xbf16>
    %cst_26 = arith.constant dense<0.000000e+00> : vector<128x12xf32>
    %33 = tpu.matmul %31, %32, %cst_26 {dimension_numbers = #tpu.dot_dimension_numbers<[1], [0], [0], [1], [0, 0, 1, 1], [], []>} : vector<128x512xbf16>, vector<512x12xbf16>, vector<128x12xf32> -> vector<128x12xf32>
    %c0_27 = arith.constant 0 : index
    %c0_28 = arith.constant 0 : index
    %34 = vector.load %arg11[%c0_27, %c0_28] : memref<1x12xf32, #tpu.memory_space<vmem>>, vector<1x12xf32>
    %35 = vector.broadcast %34 : vector<1x12xf32> to vector<128x12xf32>
    %36 = arith.addf %33, %35 : vector<128x12xf32>
    %c0_i32 = arith.constant 0 : i32
    %37 = arith.sitofp %c0_i32 : i32 to f32
    %38 = vector.broadcast %37 : f32 to vector<128x116xf32>
    %39 = tpu.concatenate %36, %38 in 1 : vector<128x12xf32>, vector<128x116xf32> -> vector<128x128xf32>
    %c0_29 = arith.constant 0 : index
    %c0_30 = arith.constant 0 : index
    %40 = vector.load %arg12[%c0_29, %c0_30] : memref<128x128xf32, #tpu.memory_space<vmem>>, vector<128x128xf32>
    tpu.vector_store %arg12[%c0_29, %c0_30], %39 {strides = array<i32>} : memref<128x128xf32, #tpu.memory_space<vmem>>, vector<128x128xf32>,
    %c0_i32_31 = arith.constant 0 : i32
    %41 = arith.sitofp %c0_i32_31 : i32 to f32
    %42 = vector.broadcast %41 : f32 to vector<128x122xf32>
    %43 = tpu.concatenate %14, %42 in 1 : vector<128x6xf32>, vector<128x122xf32> -> vector<128x128xf32>
    %c0_32 = arith.constant 0 : index
    %c0_33 = arith.constant 0 : index
    %44 = vector.load %arg13[%c0_32, %c0_33] : memref<128x128xf32, #tpu.memory_space<vmem>>, vector<128x128xf32>
    tpu.vector_store %arg13[%c0_32, %c0_33], %43 {strides = array<i32>} : memref<128x128xf32, #tpu.memory_space<vmem>>, vector<128x128xf32>,
    return
  }
  func.func @transform_0(%arg0: i32) -> (i32, i32) {
    %c0_i32 = arith.constant 0 : i32
    %c0_i32_0 = arith.constant 0 : i32
    return %arg0, %c0_i32 : i32, i32
  }
  func.func @transform_1(%arg0: i32) -> (i32, i32) {
    %c0_i32 = arith.constant 0 : i32
    %c0_i32_0 = arith.constant 0 : i32
    %c0_i32_1 = arith.constant 0 : i32
    return %c0_i32, %c0_i32_0 : i32, i32
  }
  func.func @transform_2(%arg0: i32) -> (i32, i32) {
    %c0_i32 = arith.constant 0 : i32
    %c0_i32_0 = arith.constant 0 : i32
    %c0_i32_1 = arith.constant 0 : i32
    return %c0_i32, %c0_i32_0 : i32, i32
  }
  func.func @transform_3(%arg0: i32) -> (i32, i32) {
    %c0_i32 = arith.constant 0 : i32
    %c0_i32_0 = arith.constant 0 : i32
    %c0_i32_1 = arith.constant 0 : i32
    return %c0_i32, %c0_i32_0 : i32, i32
  }
  func.func @transform_4(%arg0: i32) -> (i32, i32) {
    %c0_i32 = arith.constant 0 : i32
    %c0_i32_0 = arith.constant 0 : i32
    %c0_i32_1 = arith.constant 0 : i32
    return %c0_i32, %c0_i32_0 : i32, i32
  }
  func.func @transform_5(%arg0: i32) -> (i32, i32) {
    %c0_i32 = arith.constant 0 : i32
    %c0_i32_0 = arith.constant 0 : i32
    %c0_i32_1 = arith.constant 0 : i32
    return %c0_i32, %c0_i32_0 : i32, i32
  }
  func.func @transform_6(%arg0: i32) -> (i32, i32) {
    %c0_i32 = arith.constant 0 : i32
    %c0_i32_0 = arith.constant 0 : i32
    %c0_i32_1 = arith.constant 0 : i32
    return %c0_i32, %c0_i32_0 : i32, i32
  }
  func.func @transform_7(%arg0: i32) -> (i32, i32) {
    %c0_i32 = arith.constant 0 : i32
    %c0_i32_0 = arith.constant 0 : i32
    %c0_i32_1 = arith.constant 0 : i32
    return %c0_i32, %c0_i32_0 : i32, i32
  }
  func.func @transform_8(%arg0: i32) -> (i32, i32) {
    %c0_i32 = arith.constant 0 : i32
    %c0_i32_0 = arith.constant 0 : i32
    %c0_i32_1 = arith.constant 0 : i32
    return %c0_i32, %c0_i32_0 : i32, i32
  }
  func.func @transform_9(%arg0: i32) -> (i32, i32) {
    %c0_i32 = arith.constant 0 : i32
    %c0_i32_0 = arith.constant 0 : i32
    %c0_i32_1 = arith.constant 0 : i32
    return %c0_i32, %c0_i32_0 : i32, i32
  }
  func.func @transform_10(%arg0: i32) -> (i32, i32) {
    %c0_i32 = arith.constant 0 : i32
    %c0_i32_0 = arith.constant 0 : i32
    %c0_i32_1 = arith.constant 0 : i32
    return %c0_i32, %c0_i32_0 : i32, i32
  }
  func.func @transform_11(%arg0: i32) -> (i32, i32) {
    %c0_i32 = arith.constant 0 : i32
    %c0_i32_0 = arith.constant 0 : i32
    return %arg0, %c0_i32 : i32, i32
  }
  func.func @transform_12(%arg0: i32) -> (i32, i32) {
    %c0_i32 = arith.constant 0 : i32
    %c0_i32_0 = arith.constant 0 : i32
    return %arg0, %c0_i32 : i32, i32
  }
}

</mosaic_0001>

<bundles_post_ra>
// kernel: fknet_forward.1
= control target key start
LH: loop header
LB: loop body
LE: loop exit
PB: predicated region body
PF: predicated region fallthrough
CT: control target
= control target key end

     0   :  { %s3999_s21 = smov 0   ;;  %s5084_s0 = inlined_call_operand.vmem [shape: f32[256,12], index: 0, kind: input, shape index: {}]   ;;  %s5085_s1 = inlined_call_operand.vmem [shape: f32[12,8], index: 1, kind: input, shape index: {}]   ;;  %s5086_s2 = inlined_call_operand.vmem [shape: f32[1,8], index: 2, kind: input, shape index: {}]   ;;  %s5087_s3 = inlined_call_operand.vmem [shape: f32[8,6], index: 3, kind: input, shape index: {}]   ;;  %s5088_s4 = inlined_call_operand.vmem [shape: f32[1,6], index: 4, kind: input, shape index: {}]   ;;  %s5089_s5 = inlined_call_operand.vmem [shape: bf16[6,512], index: 5, kind: input, shape index: {}]   ;;  %s5090_s6 = inlined_call_operand.vmem [shape: f32[1,512], index: 6, kind: input, shape index: {}]   ;;  %s5091_s7 = inlined_call_operand.vmem [shape: bf16[512,512], index: 7, kind: input, shape index: {}]   ;;  %s5092_s8 = inlined_call_operand.vmem [shape: f32[1,512], index: 8, kind: input, shape index: {}]   ;;  %s5093_s9 = inlined_call_operand.vmem [shape: bf16[512,12], index: 9, kind: input, shape index: {}]   ;;  %s5094_s10 = inlined_call_operand.vmem [shape: f32[1,12], index: 10, kind: input, shape index: {}]   ;;  %s5095_s11 = inlined_call_operand.vmem [shape: f32[256,128], index: 11, kind: output, shape index: {0}]   ;;  %s5096_s12 = inlined_call_operand.vmem [shape: f32[256,128], index: 12, kind: output, shape index: {1}]  }
   0x1 LB: > { %s3240_s22 = sadd.s32 4294967295, %s3931_s21   ;;  %p3244_p0 = scmp.ge.s32.totalorder %s3931_s21, 1  ;;  %s3931_s21 = sphi %s3999_s21, %s23_s21  }
   0x2   : > { %p366_p1 = scmp.lt.s32.totalorder %s3931_s21, 3 }
   0x4   : > { %p367_p2 = pnand %p3244_p0, %p366_p1 }
   0x5   : > { %s3245_s27 = sshll.u32 (!%p367_p2), %s3240_s22, 4 }
   0x6   : > { %370 = sbr.rel (%p367_p2) target bundleno = 1156 (0x484), region = 64  ;;  %p414_p3 = scmp.lt.s32.totalorder (!%p367_p2), %s3245_s27, 31 }
   0xb   : > { %v449_v0 = vld [vmem:[%s5085_s1 + $0x8] sm:$0xf]  ;;  %vm506_vm0 = vcmask 1043456   ;;  %v448_v1 = vld [vmem:[%s5085_s1] sm:$0xff]  ;;  %s5098_s27 = smov (!%p414_p3, %s3245_s27), 31  ;;  %vm457_vm1 = vcmask 97280  }
   0xc   : > { %3634 = vmatprep.subr.msk.mxu0 %vm506_vm0, %v449_v0  ;;  %s4013_s28 = sshll.u32 %s5098_s27, 3  ;;  %v671_v18 = vld [vmem:[%s5087_s3] sm:$0xff]  ;;  %vm956_vm2 = vcmask 1042432   ;;  %v898_v20 = vld [vmem:[%s5089_s5 + $0x8] sm:$0x77]  ;;  %vm679_vm3 = vcmask 64512  }
   0xd   : > { %3635 = vmatpush3.msk.msra.mxu0 %vm506_vm0, %v449_v0  ;;  %s417_s13 = scalar_lea.vmem %s5084_s0, %s4013_s28  ;;  %3662 = vmatprep.subr.mxu1 %v671_v18  ;;  %v897_v19 = vld [vmem:[%s5089_s5] sm:$0x77]  ;;  %v3289_v23 = vcombine.high %v898_v20, %v898_v20  ;;  %v3288_v24 = vcombine.low %v898_v20, %v898_v20  ;;  %vm931_vm4 = vcmask 48128   ;;  %s4081_s14 = scalar_lea.vmem %s5096_s12, %s4013_s28 }
   0xe   : > { %3636 = vmatprep.subr.mxu0 %v448_v1  ;;  %v432_v2 = vld [vmem:[%s417_s13] sm:$0xff]  ;;  %v433_v3 = vld [vmem:[%s417_s13 + $0x8] sm:$0xff]  ;;  %v434_v4 = vld [vmem:[%s417_s13 + $0x10] sm:$0xff]  ;;  %3663 = vmatpush3.msra.mxu1 %v671_v18  ;;  %v3287_v21 = vcombine.high %v897_v19, %v897_v19  ;;  %v3286_v22 = vcombine.low %v897_v19, %v897_v19  ;;  %s5029_s23 = scalar_lea.vmem %s5095_s11, %s4013_s28 }
   0xf   : > { %3637 = vmatpush3.msra.mxu0 %v448_v1  ;;  %3638 = vmatprep.mubr.msk.f32.mxu0 %vm457_vm1, %v432_v2  ;;  %v435_v5 = vld [vmem:[%s417_s13 + $0x18] sm:$0xff]  ;;  %v436_v6 = vld [vmem:[%s417_s13 + $0x20] sm:$0xff]  ;;  %v437_v7 = vld [vmem:[%s417_s13 + $0x28] sm:$0xff]  ;;  %v964_v26 = vsel %vm956_vm2, %v3288_v24, 0 }
  0x10   : > { %3639 = vmatmul.mubr.msk.f32.vlgmr.msra.gmra.mxu0 %vm457_vm1, %v433_v3  ;;  %v438_v8 = vld [vmem:[%s417_s13 + $0x30] sm:$0xff]  ;;  %v439_v9 = vld [vmem:[%s417_s13 + $0x38] sm:$0xff]  ;;  %v440_v10 = vld [vmem:[%s417_s13 + $0x40] sm:$0xff]  ;;  %3290 = vmatprep.subr.msk.bf16.mxu1 %vm956_vm2, %v3287_v21  ;;  %v958_v25 = vsel %vm956_vm2, %v3286_v22, 0 }
  0x11   : > { %3641 = vmatprep.mubr.msk.f32.mxu0 %vm457_vm1, %v434_v4  ;;  %v441_v11 = vld [vmem:[%s417_s13 + $0x48] sm:$0xff]  ;;  %v442_v12 = vld [vmem:[%s417_s13 + $0x50] sm:$0xff]  ;;  %v443_v13 = vld [vmem:[%s417_s13 + $0x58] sm:$0xff]  ;;  %3299 = vmatprep.subr.msk.bf16.mxu0 %vm956_vm2, %v3289_v23 }
  0x12   : > { %v444_v14 = vld [vmem:[%s417_s13 + $0x60] sm:$0xff]  ;;  %v445_v15 = vld [vmem:[%s417_s13 + $0x68] sm:$0xff]  ;;  %v446_v16 = vld [vmem:[%s417_s13 + $0x70] sm:$0xff]  ;;  %1097 = vmatpush1.bf16.msra.mxu0 %v964_v26 }
  0x13   : > { %v447_v17 = vld [vmem:[%s417_s13 + $0x78] sm:$0xff]  ;;  %v3251_v27 = vld [vmem:[%s5086_s2] ss:$0 sm:$0xff] }
  0x14   : > { %3642 = vmatmul.mubr.msk.f32.gmra.mxu0 %vm457_vm1, %v435_v5 }
  0x15   : > { %3644 = vmatprep.mubr.msk.f32.mxu0 %vm457_vm1, %v436_v6 }
  0x18   : > { %3645 = vmatmul.mubr.msk.f32.gmra.mxu0 %vm457_vm1, %v437_v7 }
  0x19   : > { %3647 = vmatprep.mubr.msk.f32.mxu0 %vm457_vm1, %v438_v8 }
  0x1c   : > { %3648 = vmatmul.mubr.msk.f32.gmra.mxu0 %vm457_vm1, %v439_v9 }
  0x1d   : > { %3650 = vmatprep.mubr.msk.f32.mxu0 %vm457_vm1, %v440_v10 }
  0x20   : > { %3651 = vmatmul.mubr.msk.f32.gmra.mxu0 %vm457_vm1, %v441_v11 }
  0x21   : > { %3653 = vmatprep.mubr.msk.f32.mxu0 %vm457_vm1, %v442_v12  ;;  %v3933_v12 = vmov 0  }
  0x24   : > { %3654 = vmatmul.mubr.msk.f32.gmra.mxu0 %vm457_vm1, %v443_v13  ;;  %v3703_v13 = vld [vmem:[%s5091_s7 + $0xe4] ss:$16 sps:$4 sm:$0xff]  }
  0x25   : > { %3656 = vmatprep.mubr.msk.f32.mxu0 %vm457_vm1, %v444_v14  ;;  %v3706_v14 = vld [vmem:[%s5091_s7 + $0x2e4] ss:$16 sps:$4 sm:$0xff]  }
  0x26   : > { %2194 = vmatprep.subr.bf16.mxu0 %v3706_v14 }
  0x28   : > { %3657 = vmatmul.mubr.msk.f32.gmra.mxu0 %vm457_vm1, %v445_v15  ;;  %v4074_v15 = vld [vmem:[%s5088_s4] ss:$0 sm:$0xff] }
  0x29   : > { %3659 = vmatprep.mubr.msk.f32.mxu0 %vm457_vm1, %v446_v16 }
  0x2c   : > { %3660 = vmatmul.mubr.msk.f32.gmra.mxu0 %vm457_vm1, %v447_v17 }
  0x2d   : > { %1114 = vmatprep.mubr.bf16.mxu0 %v3933_v12 }
  0xd0   : > { %v3640_v28 = vpop.f32.mrf.mxu0 }
  0xd1   : > { %v582_v29 = vadd.f32 %v3640_v28, %v3251_v27 }
  0xd2   : > { %v576_v30 = vpop.f32.mrf.mxu0 }
  0xd3   : > { %v577_v31 = vadd.f32 %v3251_v27, %v576_v30  ;;  %v656_v35 = vmax.f32 %v582_v29, 0.0  ;;  %v3701_v30 = vld [vmem:[%s5091_s7 + $0xe0] ss:$16 sps:$4 sm:$0xff]  }
  0xd4   : > { %v3643_v32 = vpop.f32.mrf.mxu0 }
  0xd5   : > { %v655_v33 = vmax.f32 %v577_v31, 0.0  ;;  %v592_v34 = vadd.f32 %v3643_v32, %v3251_v27  ;;  %v3704_v31 = vld [vmem:[%s5091_s7 + $0x2e0] ss:$16 sps:$4 sm:$0xff]  }
  0xd6   : > { %v586_v36 = vpop.f32.mrf.mxu0 }
  0xd7   : > { %v587_v37 = vadd.f32 %v3251_v27, %v586_v36  ;;  %3664 = vmatprep.mubr.msk.f32.mxu1 %vm679_vm3, %v655_v33  ;;  %v658_v38 = vmax.f32 %v592_v34, 0.0  ;;  %v3709_v33 = vld [vmem:[%s5091_s7 + $0xc4] ss:$16 sps:$4 sm:$0xff]  }
  0xd8   : > { %3665 = vmatmul.mubr.msk.f32.vlgmr.msra.gmra.mxu1 %vm679_vm3, %v656_v35  ;;  %v3646_v39 = vpop.f32.mrf.mxu0  ;;  %v3712_v34 = vld [vmem:[%s5091_s7 + $0x2c4] ss:$16 sps:$4 sm:$0xff]  }
  0xd9   : > { %v657_v40 = vmax.f32 %v587_v37, 0.0  ;;  %v602_v41 = vadd.f32 %v3646_v39, %v3251_v27  ;;  %984 = vmatpush1.bf16.msra.mxu1 %v958_v25 }
  0xda   : > { %v596_v42 = vpop.f32.mrf.mxu0  ;;  %2081 = vmatprep.subr.bf16.mxu1 %v3703_v13 }
  0xdb   : > { %3667 = vmatprep.mubr.msk.f32.mxu1 %vm679_vm3, %v657_v40  ;;  %v597_v43 = vadd.f32 %v3251_v27, %v596_v42  ;;  %v660_v44 = vmax.f32 %v602_v41, 0.0  ;;  %v3707_v42 = vld [vmem:[%s5091_s7 + $0xc0] ss:$16 sps:$4 sm:$0xff]  }
  0xdc   : > { %3668 = vmatmul.mubr.msk.f32.gmra.mxu1 %vm679_vm3, %v658_v38  ;;  %v3649_v45 = vpop.f32.mrf.mxu0 }
  0xdd   : > { %v659_v46 = vmax.f32 %v597_v43, 0.0  ;;  %v612_v47 = vadd.f32 %v3649_v45, %v3251_v27  ;;  %v3710_v43 = vld [vmem:[%s5091_s7 + $0x2c0] ss:$16 sps:$4 sm:$0xff]   ;;  %v3715_v45 = vld [vmem:[%s5091_s7 + $0xa4] ss:$16 sps:$4 sm:$0xff]  }
  0xde   : > { %v606_v48 = vpop.f32.mrf.mxu0 }
  0xdf   : > { %3670 = vmatprep.mubr.msk.f32.mxu1 %vm679_vm3, %v659_v46  ;;  %v607_v49 = vadd.f32 %v3251_v27, %v606_v48  ;;  %v662_v50 = vmax.f32 %v612_v47, 0.0  ;;  %v3718_v46 = vld [vmem:[%s5091_s7 + $0x2a4] ss:$16 sps:$4 sm:$0xff]  }
  0xe0   : > { %3671 = vmatmul.mubr.msk.f32.gmra.mxu1 %vm679_vm3, %v660_v44  ;;  %v3652_v51 = vpop.f32.mrf.mxu0 }
  0xe1   : > { %v661_v52 = vmax.f32 %v607_v49, 0.0  ;;  %v622_v53 = vadd.f32 %v3652_v51, %v3251_v27 }
  0xe2   : > { %v616_v54 = vpop.f32.mrf.mxu0 }
  0xe3   : > { %3673 = vmatprep.mubr.msk.f32.mxu1 %vm679_vm3, %v661_v52  ;;  %v617_v55 = vadd.f32 %v3251_v27, %v616_v54  ;;  %v664_v56 = vmax.f32 %v622_v53, 0.0 }
  0xe4   : > { %3674 = vmatmul.mubr.msk.f32.gmra.mxu1 %vm679_vm3, %v662_v50  ;;  %v3655_v57 = vpop.f32.mrf.mxu0 }
  0xe5   : > { %v663_v58 = vmax.f32 %v617_v55, 0.0  ;;  %v632_v59 = vadd.f32 %v3655_v57, %v3251_v27  ;;  %v3713_v55 = vld [vmem:[%s5091_s7 + $0xa0] ss:$16 sps:$4 sm:$0xff]  }
  0xe6   : > { %v626_v60 = vpop.f32.mrf.mxu0 }
  0xe7   : > { %3676 = vmatprep.mubr.msk.f32.mxu1 %vm679_vm3, %v663_v58  ;;  %v627_v61 = vadd.f32 %v3251_v27, %v626_v60  ;;  %v666_v62 = vmax.f32 %v632_v59, 0.0  ;;  %v3721_v58 = vld [vmem:[%s5091_s7 + $0x84] ss:$16 sps:$4 sm:$0xff]  }
  0xe8   : > { %3677 = vmatmul.mubr.msk.f32.gmra.mxu1 %vm679_vm3, %v664_v56  ;;  %v3658_v63 = vpop.f32.mrf.mxu0  ;;  %v3716_v56 = vld [vmem:[%s5091_s7 + $0x2a0] ss:$16 sps:$4 sm:$0xff]   ;;  %v3724_v59 = vld [vmem:[%s5091_s7 + $0x284] ss:$16 sps:$4 sm:$0xff]  }
  0xe9   : > { %v665_v0 = vmax.f32 %v627_v61, 0.0  ;;  %v642_v1 = vadd.f32 %v3658_v63, %v3251_v27 }
  0xea   : > { %v636_v2 = vpop.f32.mrf.mxu0 }
  0xeb   : > { %3679 = vmatprep.mubr.msk.f32.mxu1 %vm679_vm3, %v665_v0  ;;  %v637_v3 = vadd.f32 %v3251_v27, %v636_v2  ;;  %v668_v4 = vmax.f32 %v642_v1, 0.0 }
  0xec   : > { %3680 = vmatmul.mubr.msk.f32.gmra.mxu1 %vm679_vm3, %v666_v62  ;;  %v3661_v5 = vpop.f32.mrf.mxu0 }
  0xed   : > { %v667_v6 = vmax.f32 %v637_v3, 0.0  ;;  %v652_v7 = vadd.f32 %v3661_v5, %v3251_v27  ;;  %v3719_v3 = vld [vmem:[%s5091_s7 + $0x80] ss:$16 sps:$4 sm:$0xff]  }
  0xee   : > { %v646_v8 = vpop.f32.mrf.mxu0 }
  0xef   : > { %3682 = vmatprep.mubr.msk.f32.mxu1 %vm679_vm3, %v667_v6  ;;  %v647_v9 = vadd.f32 %v3251_v27, %v646_v8  ;;  %v670_v10 = vmax.f32 %v652_v7, 0.0  ;;  %v3727_v6 = vld [vmem:[%s5091_s7 + $0x64] ss:$16 sps:$4 sm:$0xff]  }
  0xf0   : > { %3683 = vmatmul.mubr.msk.f32.gmra.mxu1 %vm679_vm3, %v668_v4  ;;  %v3722_v4 = vld [vmem:[%s5091_s7 + $0x280] ss:$16 sps:$4 sm:$0xff]   ;;  %v3730_v7 = vld [vmem:[%s5091_s7 + $0x264] ss:$16 sps:$4 sm:$0xff]  }
  0xf1   : > { %v669_v11 = vmax.f32 %v647_v9, 0.0 }
  0xf3   : > { %3685 = vmatprep.mubr.msk.f32.mxu1 %vm679_vm3, %v669_v11 }
  0xf4   : > { %3686 = vmatmul.mubr.msk.f32.gmra.mxu1 %vm679_vm3, %v670_v10 }
  0xf5   : > { %1001 = vmatprep.mubr.bf16.mxu1 %v3933_v12 }
 0x198   : > { %v3666_v16 = vpop.f32.mrf.mxu1 }
 0x199   : > { %v800_v17 = vadd.f32 %v3666_v16, %v4074_v15 }
 0x19a   : > { %v794_v18 = vpop.f32.mrf.mxu1 }
 0x19b   : > { %v874_v19 = vmax.f32 %v800_v17, 0.0  ;;  %v795_v20 = vadd.f32 %v4074_v15, %v794_v18  ;;  %v3725_v18 = vld [vmem:[%s5091_s7 + $0x60] ss:$16 sps:$4 sm:$0xff]  }
 0x19c   : > { %v3669_v21 = vpop.f32.mrf.mxu1 }
 0x19d   : > { %v3119_v22 = vsel %vm931_vm4, %v874_v19, 0.0  ;;  %v873_v23 = vmax.f32 %v795_v20, 0.0  ;;  %v810_v24 = vadd.f32 %v3669_v21, %v4074_v15  ;;  %v3733_v21 = vld [vmem:[%s5091_s7 + $0x44] ss:$16 sps:$4 sm:$0xff]  }
 0x19e   : > { %3135 = vst [vmem:[%s4081_s14 + $0x8] sm:$0xff] %v3119_v22  ;;  %v804_v25 = vpop.f32.mrf.mxu1  ;;  %v3736_v22 = vld [vmem:[%s5091_s7 + $0x244] ss:$16 sps:$4 sm:$0xff]  }
 0x19f   : > { %v889_v26 = vpack.c.bf16 %v874_v19, %v873_v23  ;;  %v3118_v27 = vsel %vm931_vm4, %v873_v23, 0.0  ;;  %v876_v28 = vmax.f32 %v810_v24, 0.0  ;;  %v805_v29 = vadd.f32 %v4074_v15, %v804_v25  ;;  %v3728_v19 = vld [vmem:[%s5091_s7 + $0x260] ss:$16 sps:$4 sm:$0xff]  }
 0x1a0   : > { %3134 = vst [vmem:[%s4081_s14] sm:$0xff] %v3118_v27  ;;  %v3672_v32 = vpop.f32.mrf.mxu1 }
 0x1a1   : > { %v3121_v35 = vsel %vm931_vm4, %v876_v28, 0.0  ;;  %v875_v36 = vmax.f32 %v805_v29, 0.0  ;;  %3291 = vmatmul.mubr.msk.bf16.vlgmr.msra.gmra.mxu1 %vm931_vm4, %v889_v26  ;;  %3300 = vmatmul.mubr.msk.bf16.vlgmr.msra.gmra.mxu0 %vm931_vm4, %v889_v26  ;;  %v4106_v37 = vadd.f32 %v3672_v32, %v4074_v15 }
 0x1a2   : > { %3137 = vst [vmem:[%s4081_s14 + $0x18] sm:$0xff] %v3121_v35  ;;  %v814_v38 = vpop.f32.mrf.mxu1  ;;  %1011 = vmatprep.mubr.bf16.mxu1 %v3933_v12  ;;  %1124 = vmatprep.mubr.bf16.mxu0 %v3933_v12 }
 0x1a3   : > { %v3120_v39 = vsel %vm931_vm4, %v875_v36, 0.0  ;;  %v878_v40 = vmax.f32 %v4106_v37, 0.0  ;;  %v815_v41 = vadd.f32 %v4074_v15, %v814_v38  ;;  %2082 = vmatpush1.bf16.msra.mxu1 %v3701_v30  ;;  %2195 = vmatpush1.bf16.msra.mxu0 %v3704_v31  ;;  %v890_v51 = vpack.c.bf16 %v876_v28, %v875_v36  ;;  %v3731_v30 = vld [vmem:[%s5091_s7 + $0x40] ss:$16 sps:$4 sm:$0xff]  }
 0x1a4   : > { %3136 = vst [vmem:[%s4081_s14 + $0x10] sm:$0xff] %v3120_v39  ;;  %v3675_v44 = vpop.f32.mrf.mxu1  ;;  %2083 = vmatprep.subr.bf16.mxu1 %v3709_v33  ;;  %2196 = vmatprep.subr.bf16.mxu0 %v3712_v34  ;;  %v3734_v31 = vld [vmem:[%s5091_s7 + $0x240] ss:$16 sps:$4 sm:$0xff]   ;;  %v3739_v33 = vld [vmem:[%s5091_s7 + $0x24] ss:$16 sps:$4 sm:$0xff]  }
 0x1a5   : > { %v3123_v47 = vsel %vm931_vm4, %v878_v40, 0.0  ;;  %v877_v48 = vmax.f32 %v815_v41, 0.0  ;;  %v4129_v49 = vadd.f32 %v3675_v44, %v4074_v15  ;;  %v3742_v34 = vld [vmem:[%s5091_s7 + $0x224] ss:$16 sps:$4 sm:$0xff]   ;;  %v3740_v44 = vld [vmem:[%s5091_s7 + $0x220] ss:$16 sps:$4 sm:$0xff]  }
 0x1a6   : > { %3139 = vst [vmem:[%s4081_s14 + $0x28] sm:$0xff] %v3123_v47  ;;  %v824_v50 = vpop.f32.mrf.mxu1 }
 0x1a7   : > { %v3122_v52 = vsel %vm931_vm4, %v877_v48, 0.0  ;;  %v880_v53 = vmax.f32 %v4129_v49, 0.0  ;;  %v4135_v54 = vadd.f32 %v4074_v15, %v824_v50  ;;  %2084 = vmatpush1.bf16.msra.mxu1 %v3707_v42  ;;  %2197 = vmatpush1.bf16.msra.mxu0 %v3710_v43  ;;  %v891_v13 = vpack.c.bf16 %v878_v40, %v877_v48  ;;  %v3737_v43 = vld [vmem:[%s5091_s7 + $0x20] ss:$16 sps:$4 sm:$0xff]  }
 0x1a8   : > { %3138 = vst [vmem:[%s4081_s14 + $0x20] sm:$0xff] %v3122_v52  ;;  %v3678_v57 = vpop.f32.mrf.mxu1  ;;  %2085 = vmatprep.subr.bf16.mxu1 %v3715_v45  ;;  %2198 = vmatprep.subr.bf16.mxu0 %v3718_v46  ;;  %v3748_v45 = vld [vmem:[%s5091_s7 + $0x204] ss:$16 sps:$4 sm:$0xff]   ;;  %v3743_v49 = vld [vmem:[%s5091_s7] ss:$16 sps:$4 sm:$0xff]  }
 0x1a9   : > { %3292 = vmatmul.mubr.msk.bf16.gmra.mxu1 %vm931_vm4, %v890_v51  ;;  %3301 = vmatmul.mubr.msk.bf16.gmra.mxu0 %vm931_vm4, %v890_v51  ;;  %v3125_v60 = vsel %vm931_vm4, %v880_v53, 0.0  ;;  %v879_v61 = vmax.f32 %v4135_v54, 0.0  ;;  %v4157_v62 = vadd.f32 %v3678_v57, %v4074_v15  ;;  %v3746_v50 = vld [vmem:[%s5091_s7 + $0x200] ss:$16 sps:$4 sm:$0xff]   ;;  %v3751_v51 = vld [vmem:[%s5091_s7 + $0x1e4] ss:$16 sps:$4 sm:$0xff]  }
 0x1aa   : > { %3141 = vst [vmem:[%s4081_s14 + $0x38] sm:$0xff] %v3125_v60  ;;  %1021 = vmatprep.mubr.bf16.mxu1 %v3933_v12  ;;  %1134 = vmatprep.mubr.bf16.mxu0 %v3933_v12  ;;  %v834_v63 = vpop.f32.mrf.mxu1  ;;  %v3754_v52 = vld [vmem:[%s5091_s7 + $0x3e4] ss:$16 sps:$4 sm:$0xff]   ;;  %v3749_v54 = vld [vmem:[%s5091_s7 + $0x1e0] ss:$16 sps:$4 sm:$0xff]  }
 0x1ab   : > { %v3124_v0 = vsel %vm931_vm4, %v879_v61, 0.0  ;;  %v882_v1 = vmax.f32 %v4157_v62, 0.0  ;;  %v4167_v2 = vadd.f32 %v4074_v15, %v834_v63  ;;  %2086 = vmatpush1.bf16.msra.mxu1 %v3713_v55  ;;  %2199 = vmatpush1.bf16.msra.mxu0 %v3716_v56  ;;  %v892_v39 = vpack.c.bf16 %v880_v53, %v879_v61  ;;  %v3752_v55 = vld [vmem:[%s5091_s7 + $0x3e0] ss:$16 sps:$4 sm:$0xff]   ;;  %v3757_v56 = vld [vmem:[%s5091_s7 + $0x1c4] ss:$16 sps:$4 sm:$0xff]  }
 0x1ac   : > { %3140 = vst [vmem:[%s4081_s14 + $0x30] sm:$0xff] %v3124_v0  ;;  %v3681_v5 = vpop.f32.mrf.mxu1  ;;  %2087 = vmatprep.subr.bf16.mxu1 %v3721_v58  ;;  %2200 = vmatprep.subr.bf16.mxu0 %v3724_v59  ;;  %v3760_v57 = vld [vmem:[%s5091_s7 + $0x3c4] ss:$16 sps:$4 sm:$0xff]   ;;  %v3755_v58 = vld [vmem:[%s5091_s7 + $0x1c0] ss:$16 sps:$4 sm:$0xff]  }
 0x1ad   : > { %v3127_v8 = vsel %vm931_vm4, %v882_v1, 0.0  ;;  %v881_v9 = vmax.f32 %v4167_v2, 0.0  ;;  %v4187_v10 = vadd.f32 %v3681_v5, %v4074_v15  ;;  %v3758_v59 = vld [vmem:[%s5091_s7 + $0x3c0] ss:$16 sps:$4 sm:$0xff]   ;;  %v3763_v60 = vld [vmem:[%s5091_s7 + $0x1a4] ss:$16 sps:$4 sm:$0xff]  }
 0x1ae   : > { %3143 = vst [vmem:[%s4081_s14 + $0x48] sm:$0xff] %v3127_v8  ;;  %v844_v11 = vpop.f32.mrf.mxu1  ;;  %v3766_v61 = vld [vmem:[%s5091_s7 + $0x3a4] ss:$16 sps:$4 sm:$0xff]   ;;  %v3761_v63 = vld [vmem:[%s5091_s7 + $0x1a0] ss:$16 sps:$4 sm:$0xff]  }
 0x1af   : > { %v3126_v14 = vsel %vm931_vm4, %v881_v9, 0.0  ;;  %v884_v16 = vmax.f32 %v4187_v10, 0.0  ;;  %v4195_v17 = vadd.f32 %v4074_v15, %v844_v11  ;;  %2088 = vmatpush1.bf16.msra.mxu1 %v3719_v3  ;;  %2201 = vmatpush1.bf16.msra.mxu0 %v3722_v4  ;;  %v893_v53 = vpack.c.bf16 %v882_v1, %v881_v9  ;;  %v3764_v0 = vld [vmem:[%s5091_s7 + $0x3a0] ss:$16 sps:$4 sm:$0xff]   ;;  %v3769_v1 = vld [vmem:[%s5091_s7 + $0x184] ss:$16 sps:$4 sm:$0xff]  }
 0x1b0   : > { %3142 = vst [vmem:[%s4081_s14 + $0x40] sm:$0xff] %v3126_v14  ;;  %v3684_v20 = vpop.f32.mrf.mxu1  ;;  %2089 = vmatprep.subr.bf16.mxu1 %v3727_v6  ;;  %2202 = vmatprep.subr.bf16.mxu0 %v3730_v7  ;;  %v3772_v2 = vld [vmem:[%s5091_s7 + $0x384] ss:$16 sps:$4 sm:$0xff]   ;;  %v3767_v3 = vld [vmem:[%s5091_s7 + $0x180] ss:$16 sps:$4 sm:$0xff]  }
 0x1b1   : > { %3293 = vmatmul.mubr.msk.bf16.gmra.mxu1 %vm931_vm4, %v891_v13  ;;  %3302 = vmatmul.mubr.msk.bf16.gmra.mxu0 %vm931_vm4, %v891_v13  ;;  %v3129_v23 = vsel %vm931_vm4, %v884_v16, 0.0  ;;  %v883_v24 = vmax.f32 %v4195_v17, 0.0  ;;  %v4217_v25 = vadd.f32 %v3684_v20, %v4074_v15  ;;  %v3770_v4 = vld [vmem:[%s5091_s7 + $0x380] ss:$16 sps:$4 sm:$0xff]   ;;  %v3775_v5 = vld [vmem:[%s5091_s7 + $0x164] ss:$16 sps:$4 sm:$0xff]  }
 0x1b2   : > { %1031 = vmatprep.mubr.bf16.mxu1 %v3933_v12  ;;  %1144 = vmatprep.mubr.bf16.mxu0 %v3933_v12  ;;  %3145 = vst [vmem:[%s4081_s14 + $0x58] sm:$0xff] %v3129_v23  ;;  %v854_v26 = vpop.f32.mrf.mxu1  ;;  %v3778_v6 = vld [vmem:[%s5091_s7 + $0x364] ss:$16 sps:$4 sm:$0xff]   ;;  %v3773_v8 = vld [vmem:[%s5091_s7 + $0x160] ss:$16 sps:$4 sm:$0xff]  }
 0x1b3   : > { %v3128_v27 = vsel %vm931_vm4, %v883_v24, 0.0  ;;  %v886_v28 = vmax.f32 %v4217_v25, 0.0  ;;  %v4227_v29 = vadd.f32 %v4074_v15, %v854_v26  ;;  %2090 = vmatpush1.bf16.msra.mxu1 %v3725_v18  ;;  %2203 = vmatpush1.bf16.msra.mxu0 %v3728_v19  ;;  %v894_v62 = vpack.c.bf16 %v884_v16, %v883_v24  ;;  %v3776_v9 = vld [vmem:[%s5091_s7 + $0x360] ss:$16 sps:$4 sm:$0xff]   ;;  %v3781_v11 = vld [vmem:[%s5091_s7 + $0x144] ss:$16 sps:$4 sm:$0xff]  }
 0x1b4   : > { %3144 = vst [vmem:[%s4081_s14 + $0x50] sm:$0xff] %v3128_v27  ;;  %v3687_v32 = vpop.f32.mrf.mxu1  ;;  %2091 = vmatprep.subr.bf16.mxu1 %v3733_v21  ;;  %2204 = vmatprep.subr.bf16.mxu0 %v3736_v22  ;;  %v3784_v13 = vld [vmem:[%s5091_s7 + $0x344] ss:$16 sps:$4 sm:$0xff]   ;;  %v3782_v14 = vld [vmem:[%s5091_s7 + $0x340] ss:$16 sps:$4 sm:$0xff]   ;;  %v901_v26 = vlaneseq }
 0x1b5   : > { %v3131_v35 = vsel %vm931_vm4, %v886_v28, 0.0  ;;  %v885_v36 = vmax.f32 %v4227_v29, 0.0  ;;  %v4247_v37 = vadd.f32 %v3687_v32, %v4074_v15  ;;  %v3787_v16 = vld [vmem:[%s5091_s7 + $0x124] ss:$16 sps:$4 sm:$0xff]   ;;  %v3785_v18 = vld [vmem:[%s5091_s7 + $0x120] ss:$16 sps:$4 sm:$0xff]  }
 0x1b6   : > { %3147 = vst [vmem:[%s4081_s14 + $0x68] sm:$0xff] %v3131_v35  ;;  %v864_v38 = vpop.f32.mrf.mxu1  ;;  %v3790_v17 = vld [vmem:[%s5091_s7 + $0x324] ss:$16 sps:$4 sm:$0xff]   ;;  %v3788_v19 = vld [vmem:[%s5091_s7 + $0x320] ss:$16 sps:$4 sm:$0xff]   ;;  %v4425_v27 = vshrl.u32 %v901_v26, 7 }
 0x1b7   : > { %v3130_v40 = vsel %vm931_vm4, %v885_v36, 0.0  ;;  %v888_v41 = vmax.f32 %v4247_v37, 0.0  ;;  %v4259_v42 = vadd.f32 %v4074_v15, %v864_v38  ;;  %2092 = vmatpush1.bf16.msra.mxu1 %v3731_v30  ;;  %2205 = vmatpush1.bf16.msra.mxu0 %v3734_v31  ;;  %v3745_v15 = vld [vmem:[%s5091_s7 + $0x4] ss:$16 sps:$4 sm:$0xff]   ;;  %v895_v7 = vpack.c.bf16 %v886_v28, %v885_v36  ;;  %v3791_v22 = vld [vmem:[%s5091_s7 + $0x100] ss:$16 sps:$4 sm:$0xff]  }
 0x1b8   : > { %3146 = vst [vmem:[%s4081_s14 + $0x60] sm:$0xff] %v3130_v40  ;;  %2093 = vmatprep.subr.bf16.mxu1 %v3739_v33  ;;  %2206 = vmatprep.subr.bf16.mxu0 %v3742_v34  ;;  %v3793_v20 = vld [vmem:[%s5091_s7 + $0x104] ss:$16 sps:$4 sm:$0xff]   ;;  %v3794_v23 = vld [vmem:[%s5091_s7 + $0x300] ss:$16 sps:$4 sm:$0xff]   ;;  %v907_v28 = vsub.s32 1, %v4425_v27 }
 0x1b9   : > { %3294 = vmatmul.mubr.msk.bf16.gmra.mxu1 %vm931_vm4, %v892_v39  ;;  %3303 = vmatmul.mubr.msk.bf16.gmra.mxu0 %vm931_vm4, %v892_v39  ;;  %v3133_v46 = vsel %vm931_vm4, %v888_v41, 0.0  ;;  %v887_v47 = vmax.f32 %v4259_v42, 0.0  ;;  %v3796_v21 = vld [vmem:[%s5091_s7 + $0x304] ss:$16 sps:$4 sm:$0xff]   ;;  %v3799_v24 = vld [vmem:[%s5091_s7 + $0xec] ss:$16 sps:$4 sm:$0xff]  }
 0x1ba   : > { %1041 = vmatprep.mubr.bf16.mxu1 %v3933_v12  ;;  %1154 = vmatprep.mubr.bf16.mxu0 %v3933_v12  ;;  %3149 = vst [vmem:[%s4081_s14 + $0x78] sm:$0xff] %v3133_v46  ;;  %v3802_v25 = vld [vmem:[%s5091_s7 + $0x2ec] ss:$16 sps:$4 sm:$0xff]   ;;  %v915_v29 = vsub.s32 3, %v4425_v27  ;;  %v903_v30 = vsub.s32 0, %v4425_v27  ;;  %v911_v31 = vsub.s32 2, %v4425_v27 }
 0x1bb   : > { %v3132_v48 = vsel %vm931_vm4, %v887_v47, 0.0  ;;  %2094 = vmatpush1.bf16.msra.mxu1 %v3737_v43  ;;  %2207 = vmatpush1.bf16.msra.mxu0 %v3740_v44  ;;  %v896_v10 = vpack.c.bf16 %v888_v41, %v887_v47  ;;  %v899_v32 = vld [vmem:[%s5090_s6] sm:$0xf] }
 0x1bc   : > { %3148 = vst [vmem:[%s4081_s14 + $0x70] sm:$0xff] %v3132_v48  ;;  %2095 = vmatprep.subr.bf16.mxu1 %v3745_v15  ;;  %2208 = vmatprep.subr.bf16.mxu0 %v3748_v45  ;;  %v4436_v35 = vrot.slane %v899_v32, %v907_v28  ;;  %v4440_v36 = vrot.slane %v899_v32, %v915_v29 }
 0x1bd   : > { %v4444_v37 = vrot.slane %v899_v32, %v903_v30  ;;  %v4448_v38 = vrot.slane %v899_v32, %v911_v31  ;;  %v3811_v32 = vld [vmem:[%s5091_s7 + $0xac] ss:$16 sps:$4 sm:$0xff]  }
 0x1bf   : > { %2096 = vmatpush1.bf16.msra.mxu1 %v3743_v49  ;;  %2209 = vmatpush1.bf16.msra.mxu0 %v3746_v50 }
 0x1c0   : > { %2097 = vmatprep.subr.bf16.mxu1 %v3751_v51  ;;  %2210 = vmatprep.subr.bf16.mxu0 %v3754_v52 }
 0x1c1   : > { %3295 = vmatmul.mubr.msk.bf16.gmra.mxu1 %vm931_vm4, %v893_v53  ;;  %3304 = vmatmul.mubr.msk.bf16.gmra.mxu0 %vm931_vm4, %v893_v53 }
 0x1c2   : > { %1051 = vmatprep.mubr.bf16.mxu1 %v3933_v12  ;;  %1164 = vmatprep.mubr.bf16.mxu0 %v3933_v12 }
 0x1c3   : > { %2098 = vmatpush2.bf16.msra.mxu1 %v3749_v54  ;;  %2211 = vmatpush2.bf16.msra.mxu0 %v3752_v55 }
 0x1c4   : > { %2099 = vmatprep.subr.bf16.mxu1 %v3757_v56  ;;  %2212 = vmatprep.subr.bf16.mxu0 %v3760_v57 }
 0x1c7   : > { %2100 = vmatpush2.bf16.msra.mxu1 %v3755_v58  ;;  %2213 = vmatpush2.bf16.msra.mxu0 %v3758_v59 }
 0x1c8   : > { %2101 = vmatprep.subr.bf16.mxu1 %v3763_v60  ;;  %2214 = vmatprep.subr.bf16.mxu0 %v3766_v61 }
 0x1c9   : > { %3296 = vmatmul.mubr.msk.bf16.gmra.mxu1 %vm931_vm4, %v894_v62  ;;  %3305 = vmatmul.mubr.msk.bf16.gmra.mxu0 %vm931_vm4, %v894_v62 }
 0x1ca   : > { %1061 = vmatprep.mubr.bf16.mxu1 %v3933_v12  ;;  %1174 = vmatprep.mubr.bf16.mxu0 %v3933_v12 }
 0x1cb   : > { %2102 = vmatpush2.bf16.msra.mxu1 %v3761_v63  ;;  %2215 = vmatpush2.bf16.msra.mxu0 %v3764_v0 }
 0x1cc   : > { %2103 = vmatprep.subr.bf16.mxu1 %v3769_v1  ;;  %2216 = vmatprep.subr.bf16.mxu0 %v3772_v2  ;;  %v3797_v2 = vld [vmem:[%s5091_s7 + $0xe8] ss:$16 sps:$4 sm:$0xff]  }
 0x1cf   : > { %2104 = vmatpush2.bf16.msra.mxu1 %v3767_v3  ;;  %2217 = vmatpush2.bf16.msra.mxu0 %v3770_v4  ;;  %v3800_v3 = vld [vmem:[%s5091_s7 + $0x2e8] ss:$16 sps:$4 sm:$0xff]  }
 0x1d0   : > { %2105 = vmatprep.subr.bf16.mxu1 %v3775_v5  ;;  %2218 = vmatprep.subr.bf16.mxu0 %v3778_v6 }
 0x1d1   : > { %3297 = vmatmul.mubr.msk.bf16.gmra.mxu1 %vm931_vm4, %v895_v7  ;;  %3306 = vmatmul.mubr.msk.bf16.gmra.mxu0 %vm931_vm4, %v895_v7 }
 0x1d2   : > { %1071 = vmatprep.mubr.bf16.mxu1 %v3933_v12  ;;  %1184 = vmatprep.mubr.bf16.mxu0 %v3933_v12  ;;  %v3779_v12 = vld [vmem:[%s5091_s7 + $0x140] ss:$16 sps:$4 sm:$0xff]  }
 0x1d3   : > { %2106 = vmatpush2.bf16.msra.mxu1 %v3773_v8  ;;  %2219 = vmatpush2.bf16.msra.mxu0 %v3776_v9  ;;  %v3805_v8 = vld [vmem:[%s5091_s7 + $0xcc] ss:$16 sps:$4 sm:$0xff]  }
 0x1d4   : > { %2107 = vmatprep.subr.bf16.mxu1 %v3781_v11  ;;  %2220 = vmatprep.subr.bf16.mxu0 %v3784_v13  ;;  %v3808_v9 = vld [vmem:[%s5091_s7 + $0x2cc] ss:$16 sps:$4 sm:$0xff]  }
 0x1d7   : > { %2108 = vmatpush2.bf16.msra.mxu1 %v3779_v12  ;;  %2221 = vmatpush2.bf16.msra.mxu0 %v3782_v14 }
 0x1d8   : > { %2109 = vmatprep.subr.bf16.mxu1 %v3787_v16  ;;  %2222 = vmatprep.subr.bf16.mxu0 %v3790_v17 }
 0x1d9   : > { %3298 = vmatmul.mubr.msk.bf16.gmra.mxu1 %vm931_vm4, %v896_v10  ;;  %3307 = vmatmul.mubr.msk.bf16.gmra.mxu0 %vm931_vm4, %v896_v10 }
 0x1db   : > { %2110 = vmatpush2.bf16.msra.mxu1 %v3785_v18  ;;  %2223 = vmatpush2.bf16.msra.mxu0 %v3788_v19 }
 0x1dc   : > { %2111 = vmatprep.subr.bf16.mxu1 %v3793_v20  ;;  %2224 = vmatprep.subr.bf16.mxu0 %v3796_v21  ;;  %v3803_v21 = vld [vmem:[%s5091_s7 + $0xc8] ss:$16 sps:$4 sm:$0xff]  }
 0x1df   : > { %2112 = vmatpush2.bf16.msra.mxu1 %v3791_v22  ;;  %2225 = vmatpush2.bf16.msra.mxu0 %v3794_v23  ;;  %v3806_v22 = vld [vmem:[%s5091_s7 + $0x2c8] ss:$16 sps:$4 sm:$0xff]  }
 0x1e0   : > { %2307 = vmatprep.subr.bf16.mxu1 %v3799_v24  ;;  %2420 = vmatprep.subr.bf16.mxu0 %v3802_v25 }
 0x261   : > { %v1003_v33 = vpop.f32.mrf.mxu1  ;;  %v1116_v34 = vpop.f32.mrf.mxu0 }
 0x262   : > { %v1004_v46 = vadd.f32 %v1003_v33, %v4444_v37  ;;  %v1117_v47 = vadd.f32 %v1116_v34, %v4448_v38  ;;  %v3814_v33 = vld [vmem:[%s5091_s7 + $0x2ac] ss:$16 sps:$4 sm:$0xff]  }
 0x263   : > { %v1005_v39 = vpop.f32.mrf.mxu1  ;;  %v1118_v40 = vpop.f32.mrf.mxu0 }
 0x264   : > { %v1006_v43 = vadd.f32 %v1005_v39, %v4436_v35  ;;  %v1119_v44 = vadd.f32 %v1118_v40, %v4440_v36  ;;  %v1195_v60 = vmax.f32 %v1004_v46, 0.0  ;;  %v1197_v61 = vmax.f32 %v1117_v47, 0.0  ;;  %v3809_v46 = vld [vmem:[%s5091_s7 + $0xa8] ss:$16 sps:$4 sm:$0xff]  }
 0x265   : > { %v1007_v41 = vpop.f32.mrf.mxu1  ;;  %v1120_v42 = vpop.f32.mrf.mxu0 }
 0x266   : > { %v1008_v15 = vadd.f32 %v1007_v41, %v4444_v37  ;;  %v1121_v45 = vadd.f32 %v1120_v42, %v4448_v38  ;;  %v1196_v56 = vmax.f32 %v1006_v43, 0.0  ;;  %v1198_v57 = vmax.f32 %v1119_v44, 0.0 }
 0x267   : > { %v1009_v48 = vpop.f32.mrf.mxu1  ;;  %v1122_v49 = vpop.f32.mrf.mxu0 }
 0x268   : > { %v1010_v50 = vadd.f32 %v1009_v48, %v4436_v35  ;;  %v1123_v51 = vadd.f32 %v1122_v49, %v4440_v36  ;;  %v1199_v52 = vmax.f32 %v1008_v15, 0.0  ;;  %v1201_v53 = vmax.f32 %v1121_v45, 0.0 }
 0x269   : > { %v1013_v54 = vpop.f32.mrf.mxu1  ;;  %v1126_v55 = vpop.f32.mrf.mxu0 }
 0x26a   : > { %v1200_v58 = vmax.f32 %v1010_v50, 0.0  ;;  %v1202_v59 = vmax.f32 %v1123_v51, 0.0  ;;  %v4468_v4 = vpack.c.bf16 %v1199_v52, %v1195_v60  ;;  %v4470_v5 = vpack.c.bf16 %v1201_v53, %v1197_v61  ;;  %v3812_v52 = vld [vmem:[%s5091_s7 + $0x2a8] ss:$16 sps:$4 sm:$0xff]   ;;  %v3817_v53 = vld [vmem:[%s5091_s7 + $0x8c] ss:$16 sps:$4 sm:$0xff]  }
 0x26b   : > { %v1015_v62 = vpop.f32.mrf.mxu1  ;;  %v1128_v63 = vpop.f32.mrf.mxu0  ;;  %v1014_v12 = vadd.f32 %v1013_v54, %v4444_v37  ;;  %v1127_v14 = vadd.f32 %v1126_v55, %v4448_v38 }
 0x26c   : > { %v4458_v0 = vpack.c.bf16 %v1200_v58, %v1196_v56  ;;  %v4460_v1 = vpack.c.bf16 %v1202_v59, %v1198_v57  ;;  %v1016_v10 = vadd.f32 %v1015_v62, %v4436_v35  ;;  %v1129_v16 = vadd.f32 %v1128_v63, %v4440_v36  ;;  %v3820_v58 = vld [vmem:[%s5091_s7 + $0x28c] ss:$16 sps:$4 sm:$0xff]  }
 0x26d   : > { %v1017_v6 = vpop.f32.mrf.mxu1  ;;  %v1130_v7 = vpop.f32.mrf.mxu0  ;;  %v1203_v41 = vmax.f32 %v1014_v12, 0.0  ;;  %v1205_v42 = vmax.f32 %v1127_v14, 0.0 }
 0x26e   : > { %v1018_v11 = vadd.f32 %v1017_v6, %v4444_v37  ;;  %v1131_v13 = vadd.f32 %v1130_v7, %v4448_v38  ;;  %2113 = vmatprep.mubr.bf16.mxu1 %v4458_v0  ;;  %2226 = vmatprep.mubr.bf16.mxu0 %v4460_v1  ;;  %v1204_v34 = vmax.f32 %v1016_v10, 0.0  ;;  %v1206_v43 = vmax.f32 %v1129_v16, 0.0  ;;  %v3818_v10 = vld [vmem:[%s5091_s7 + $0x288] ss:$16 sps:$4 sm:$0xff]  }
 0x26f   : > { %v1019_v17 = vpop.f32.mrf.mxu1  ;;  %v1132_v18 = vpop.f32.mrf.mxu0  ;;  %2114 = vmatmul.mubr.bf16.vlgmr.msra.gmra.mxu1 %v4468_v4  ;;  %2227 = vmatmul.mubr.bf16.vlgmr.msra.gmra.mxu0 %v4470_v5 }
 0x270   : > { %v1020_v19 = vadd.f32 %v1019_v17, %v4436_v35  ;;  %v1133_v20 = vadd.f32 %v1132_v18, %v4440_v36  ;;  %2308 = vmatpush1.bf16.msra.mxu1 %v3797_v2  ;;  %2421 = vmatpush1.bf16.msra.mxu0 %v3800_v3  ;;  %v1207_v23 = vmax.f32 %v1018_v11, 0.0  ;;  %v1209_v24 = vmax.f32 %v1131_v13, 0.0  ;;  %v3815_v3 = vld [vmem:[%s5091_s7 + $0x88] ss:$16 sps:$4 sm:$0xff]   ;;  %v3823_v11 = vld [vmem:[%s5091_s7 + $0x6c] ss:$16 sps:$4 sm:$0xff]  }
 0x271   : > { %v1023_v25 = vpop.f32.mrf.mxu1  ;;  %v1136_v26 = vpop.f32.mrf.mxu0  ;;  %2309 = vmatprep.subr.bf16.mxu1 %v3805_v8  ;;  %2422 = vmatprep.subr.bf16.mxu0 %v3808_v9 }
 0x272   : > { %v1208_v39 = vmax.f32 %v1020_v19, 0.0  ;;  %v1210_v40 = vmax.f32 %v1133_v20, 0.0  ;;  %v4507_v47 = vpack.c.bf16 %v1207_v23, %v1203_v41  ;;  %v4509_v48 = vpack.c.bf16 %v1209_v24, %v1205_v42  ;;  %v3821_v24 = vld [vmem:[%s5091_s7 + $0x68] ss:$16 sps:$4 sm:$0xff]  }
 0x273   : > { %v1025_v44 = vpop.f32.mrf.mxu1  ;;  %v1138_v15 = vpop.f32.mrf.mxu0  ;;  %v1024_v59 = vadd.f32 %v1023_v25, %v4444_v37  ;;  %v1137_v60 = vadd.f32 %v1136_v26, %v4448_v38 }
 0x274   : > { %2310 = vmatpush1.bf16.msra.mxu1 %v3803_v21  ;;  %2423 = vmatpush1.bf16.msra.mxu0 %v3806_v22  ;;  %v4502_v45 = vpack.c.bf16 %v1208_v39, %v1204_v34  ;;  %v4511_v51 = vpack.c.bf16 %v1210_v40, %v1206_v43  ;;  %v1026_v54 = vadd.f32 %v1025_v44, %v4436_v35  ;;  %v3826_v21 = vld [vmem:[%s5091_s7 + $0x26c] ss:$16 sps:$4 sm:$0xff]   ;;  %v3824_v39 = vld [vmem:[%s5091_s7 + $0x268] ss:$16 sps:$4 sm:$0xff]  }
 0x275   : > { %v1027_v49 = vpop.f32.mrf.mxu1  ;;  %v1140_v50 = vpop.f32.mrf.mxu0  ;;  %2311 = vmatprep.subr.bf16.mxu1 %v3811_v32  ;;  %2424 = vmatprep.subr.bf16.mxu0 %v3814_v33  ;;  %v1139_v55 = vadd.f32 %v1138_v15, %v4440_v36  ;;  %v1211_v17 = vmax.f32 %v1024_v59, 0.0  ;;  %v1213_v18 = vmax.f32 %v1137_v60, 0.0  ;;  %v3829_v40 = vld [vmem:[%s5091_s7 + $0x4c] ss:$16 sps:$4 sm:$0xff]   ;;  %v3830_v59 = vld [vmem:[%s5091_s7 + $0x248] ss:$16 sps:$4 sm:$0xff]  }
 0x276   : > { %v1028_v56 = vadd.f32 %v1027_v49, %v4444_v37  ;;  %v1141_v57 = vadd.f32 %v1140_v50, %v4448_v38  ;;  %2123 = vmatprep.mubr.bf16.mxu1 %v4502_v45  ;;  %2236 = vmatprep.mubr.bf16.mxu0 %v4511_v51  ;;  %v1212_v13 = vmax.f32 %v1026_v54, 0.0  ;;  %v3832_v44 = vld [vmem:[%s5091_s7 + $0x24c] ss:$16 sps:$4 sm:$0xff]   ;;  %v3827_v54 = vld [vmem:[%s5091_s7 + $0x48] ss:$16 sps:$4 sm:$0xff]  }
 0x277   : > { %v1029_v61 = vpop.f32.mrf.mxu1  ;;  %v1142_v62 = vpop.f32.mrf.mxu0  ;;  %2124 = vmatmul.mubr.bf16.gmra.mxu1 %v4507_v47  ;;  %2237 = vmatmul.mubr.bf16.gmra.mxu0 %v4509_v48  ;;  %v1214_v12 = vmax.f32 %v1139_v55, 0.0  ;;  %v3835_v60 = vld [vmem:[%s5091_s7 + $0x2c] ss:$16 sps:$4 sm:$0xff]  }
 0x278   : > { %v1030_v63 = vadd.f32 %v1029_v61, %v4436_v35  ;;  %v1143_v2 = vadd.f32 %v1142_v62, %v4440_v36  ;;  %2312 = vmatpush1.bf16.msra.mxu1 %v3809_v46  ;;  %v1215_v6 = vmax.f32 %v1028_v56, 0.0  ;;  %v1217_v7 = vmax.f32 %v1141_v57, 0.0  ;;  %2425 = vmatpush1.bf16.msra.mxu0 %v3812_v52 }
 0x279   : > { %v1033_v8 = vpop.f32.mrf.mxu1  ;;  %v1146_v9 = vpop.f32.mrf.mxu0  ;;  %2313 = vmatprep.subr.bf16.mxu1 %v3817_v53  ;;  %2426 = vmatprep.subr.bf16.mxu0 %v3820_v58 }
 0x27a   : > { %v1216_v14 = vmax.f32 %v1030_v63, 0.0  ;;  %v1218_v16 = vmax.f32 %v1143_v2, 0.0  ;;  %v4553_v25 = vpack.c.bf16 %v1215_v6, %v1211_v17  ;;  %v4555_v26 = vpack.c.bf16 %v1217_v7, %v1213_v18 }
 0x27b   : > { %v1035_v19 = vpop.f32.mrf.mxu1  ;;  %v1148_v20 = vpop.f32.mrf.mxu0  ;;  %v1034_v15 = vadd.f32 %v1033_v8, %v4444_v37  ;;  %v1147_v46 = vadd.f32 %v1146_v9, %v4448_v38  ;;  %v3838_v9 = vld [vmem:[%s5091_s7 + $0x22c] ss:$16 sps:$4 sm:$0xff]  }
 0x27c   : > { %2314 = vmatpush1.bf16.msra.mxu1 %v3815_v3  ;;  %v4546_v22 = vpack.c.bf16 %v1216_v14, %v1212_v13  ;;  %v4548_v23 = vpack.c.bf16 %v1218_v16, %v1214_v12  ;;  %v1036_v32 = vadd.f32 %v1035_v19, %v4436_v35  ;;  %2427 = vmatpush1.bf16.msra.mxu0 %v3818_v10  ;;  %v3833_v13 = vld [vmem:[%s5091_s7 + $0x28] ss:$16 sps:$4 sm:$0xff]  }
 0x27d   : > { %v1037_v33 = vpop.f32.mrf.mxu1  ;;  %v1150_v34 = vpop.f32.mrf.mxu0  ;;  %2315 = vmatprep.subr.bf16.mxu1 %v3823_v11  ;;  %v1149_v41 = vadd.f32 %v1148_v20, %v4440_v36  ;;  %2428 = vmatprep.subr.bf16.mxu0 %v3826_v21  ;;  %v1219_v3 = vmax.f32 %v1034_v15, 0.0  ;;  %v1221_v6 = vmax.f32 %v1147_v46, 0.0  ;;  %v3836_v19 = vld [vmem:[%s5091_s7 + $0x228] ss:$16 sps:$4 sm:$0xff]   ;;  %v3841_v20 = vld [vmem:[%s5091_s7 + $0xc] ss:$16 sps:$4 sm:$0xff]  }
 0x27e   : > { %v1038_v42 = vadd.f32 %v1037_v33, %v4444_v37  ;;  %v1151_v43 = vadd.f32 %v1150_v34, %v4448_v38  ;;  %2133 = vmatprep.mubr.bf16.mxu1 %v4546_v22  ;;  %2246 = vmatprep.mubr.bf16.mxu0 %v4548_v23  ;;  %v1220_v61 = vmax.f32 %v1036_v32, 0.0  ;;  %v3844_v33 = vld [vmem:[%s5091_s7 + $0x20c] ss:$16 sps:$4 sm:$0xff]  }
 0x27f   : > { %v1039_v49 = vpop.f32.mrf.mxu1  ;;  %v1152_v50 = vpop.f32.mrf.mxu0  ;;  %2134 = vmatmul.mubr.bf16.gmra.mxu1 %v4553_v25  ;;  %2247 = vmatmul.mubr.bf16.gmra.mxu0 %v4555_v26  ;;  %v1222_v62 = vmax.f32 %v1149_v41, 0.0 }
 0x280   : > { %v1040_v52 = vadd.f32 %v1039_v49, %v4436_v35  ;;  %v1153_v53 = vadd.f32 %v1152_v50, %v4440_v36  ;;  %2316 = vmatpush1.bf16.msra.mxu1 %v3821_v24  ;;  %v1223_v55 = vmax.f32 %v1038_v42, 0.0  ;;  %v1225_v56 = vmax.f32 %v1151_v43, 0.0  ;;  %2429 = vmatpush1.bf16.msra.mxu0 %v3824_v39 }
 0x281   : > { %v1043_v57 = vpop.f32.mrf.mxu1  ;;  %v1156_v58 = vpop.f32.mrf.mxu0  ;;  %2317 = vmatprep.subr.bf16.mxu1 %v3829_v40  ;;  %2430 = vmatprep.subr.bf16.mxu0 %v3832_v44  ;;  %v3839_v44 = vld [vmem:[%s5091_s7 + $0x8] ss:$16 sps:$4 sm:$0xff]  }
 0x282   : > { %v1224_v63 = vmax.f32 %v1040_v52, 0.0  ;;  %v1226_v2 = vmax.f32 %v1153_v53, 0.0  ;;  %v4597_v12 = vpack.c.bf16 %v1223_v55, %v1219_v3  ;;  %v4599_v14 = vpack.c.bf16 %v1225_v56, %v1221_v6  ;;  %v3842_v52 = vld [vmem:[%s5091_s7 + $0x208] ss:$16 sps:$4 sm:$0xff]   ;;  %v3847_v53 = vld [vmem:[%s5091_s7 + $0x1ec] ss:$16 sps:$4 sm:$0xff]  }
 0x283   : > { %v1045_v7 = vpop.f32.mrf.mxu1  ;;  %v1158_v8 = vpop.f32.mrf.mxu0  ;;  %v1044_v34 = vadd.f32 %v1043_v57, %v4444_v37  ;;  %v1157_v39 = vadd.f32 %v1156_v58, %v4448_v38  ;;  %v3845_v3 = vld [vmem:[%s5091_s7 + $0x1e8] ss:$16 sps:$4 sm:$0xff]  }
 0x284   : > { %2318 = vmatpush1.bf16.msra.mxu1 %v3827_v54  ;;  %v4590_v10 = vpack.c.bf16 %v1224_v63, %v1220_v61  ;;  %v4592_v11 = vpack.c.bf16 %v1226_v2, %v1222_v62  ;;  %v1046_v16 = vadd.f32 %v1045_v7, %v4436_v35  ;;  %2431 = vmatpush1.bf16.msra.mxu0 %v3830_v59  ;;  %v3850_v62 = vld [vmem:[%s5091_s7 + $0x3ec] ss:$16 sps:$4 sm:$0xff]  }
 0x285   : > { %v1047_v17 = vpop.f32.mrf.mxu1  ;;  %v1160_v18 = vpop.f32.mrf.mxu0  ;;  %2319 = vmatprep.subr.bf16.mxu1 %v3835_v60  ;;  %v1159_v21 = vadd.f32 %v1158_v8, %v4440_v36  ;;  %2432 = vmatprep.subr.bf16.mxu0 %v3838_v9  ;;  %v1227_v58 = vmax.f32 %v1044_v34, 0.0  ;;  %v1229_v59 = vmax.f32 %v1157_v39, 0.0 }
 0x286   : > { %v1048_v24 = vadd.f32 %v1047_v17, %v4444_v37  ;;  %v1161_v32 = vadd.f32 %v1160_v18, %v4448_v38  ;;  %2143 = vmatprep.mubr.bf16.mxu1 %v4590_v10  ;;  %2256 = vmatprep.mubr.bf16.mxu0 %v4592_v11  ;;  %v1228_v54 = vmax.f32 %v1046_v16, 0.0  ;;  %v3848_v16 = vld [vmem:[%s5091_s7 + $0x3e8] ss:$16 sps:$4 sm:$0xff]   ;;  %v3853_v17 = vld [vmem:[%s5091_s7 + $0x1cc] ss:$16 sps:$4 sm:$0xff]  }
 0x287   : > { %v1049_v40 = vpop.f32.mrf.mxu1  ;;  %v1162_v41 = vpop.f32.mrf.mxu0  ;;  %2144 = vmatmul.mubr.bf16.gmra.mxu1 %v4597_v12  ;;  %2257 = vmatmul.mubr.bf16.gmra.mxu0 %v4599_v14  ;;  %v1230_v55 = vmax.f32 %v1159_v21, 0.0  ;;  %v3856_v21 = vld [vmem:[%s5091_s7 + $0x3cc] ss:$16 sps:$4 sm:$0xff]  }
 0x288   : > { %v1050_v42 = vadd.f32 %v1049_v40, %v4436_v35  ;;  %v1163_v43 = vadd.f32 %v1162_v41, %v4440_v36  ;;  %2320 = vmatpush1.bf16.msra.mxu1 %v3833_v13  ;;  %v1231_v15 = vmax.f32 %v1048_v24, 0.0  ;;  %v1233_v46 = vmax.f32 %v1161_v32, 0.0  ;;  %2433 = vmatpush1.bf16.msra.mxu0 %v3836_v19  ;;  %v3851_v41 = vld [vmem:[%s5091_s7 + $0x1c8] ss:$16 sps:$4 sm:$0xff]  }
 0x289   : > { %v1053_v49 = vpop.f32.mrf.mxu1  ;;  %v1166_v50 = vpop.f32.mrf.mxu0  ;;  %2321 = vmatprep.subr.bf16.mxu1 %v3841_v20  ;;  %2434 = vmatprep.subr.bf16.mxu0 %v3844_v33 }
 0x28a   : > { %v1232_v56 = vmax.f32 %v1050_v42, 0.0  ;;  %v1234_v57 = vmax.f32 %v1163_v43, 0.0  ;;  %v4641_v6 = vpack.c.bf16 %v1231_v15, %v1227_v58  ;;  %v4643_v7 = vpack.c.bf16 %v1233_v46, %v1229_v59  ;;  %v3854_v46 = vld [vmem:[%s5091_s7 + $0x3c8] ss:$16 sps:$4 sm:$0xff]   ;;  %v3862_v59 = vld [vmem:[%s5091_s7 + $0x3ac] ss:$16 sps:$4 sm:$0xff]  }
 0x28b   : > { %v1055_v60 = vpop.f32.mrf.mxu1  ;;  %v1168_v61 = vpop.f32.mrf.mxu0  ;;  %v1054_v24 = vadd.f32 %v1053_v49, %v4444_v37  ;;  %v1167_v32 = vadd.f32 %v1166_v50, %v4448_v38  ;;  %v3859_v49 = vld [vmem:[%s5091_s7 + $0x1ac] ss:$16 sps:$4 sm:$0xff]  }
 0x28c   : > { %v4634_v63 = vpack.c.bf16 %v1232_v56, %v1228_v54  ;;  %v4636_v2 = vpack.c.bf16 %v1234_v57, %v1230_v55  ;;  %2322 = vmatpush1.bf16.msra.mxu1 %v3839_v44  ;;  %v1056_v8 = vadd.f32 %v1055_v60, %v4436_v35  ;;  %2435 = vmatpush1.bf16.msra.mxu0 %v3842_v52 }
 0x28d   : > { %v1057_v9 = vpop.f32.mrf.mxu1  ;;  %v1170_v13 = vpop.f32.mrf.mxu0  ;;  %2323 = vmatprep.subr.bf16.mxu1 %v3847_v53  ;;  %v1169_v18 = vadd.f32 %v1168_v61, %v4440_v36  ;;  %2436 = vmatprep.subr.bf16.mxu0 %v3850_v62  ;;  %v1235_v55 = vmax.f32 %v1054_v24, 0.0  ;;  %v1237_v56 = vmax.f32 %v1167_v32, 0.0  ;;  %v3857_v62 = vld [vmem:[%s5091_s7 + $0x1a8] ss:$16 sps:$4 sm:$0xff]   ;;  %v3868_v24 = vld [vmem:[%s5091_s7 + $0x38c] ss:$16 sps:$4 sm:$0xff]  }
 0x28e   : > { %v1058_v19 = vadd.f32 %v1057_v9, %v4444_v37  ;;  %v1171_v20 = vadd.f32 %v1170_v13, %v4448_v38  ;;  %2153 = vmatprep.mubr.bf16.mxu1 %v4634_v63  ;;  %2266 = vmatprep.mubr.bf16.mxu0 %v4636_v2  ;;  %v1236_v50 = vmax.f32 %v1056_v8, 0.0 }
 0x28f   : > { %v1059_v33 = vpop.f32.mrf.mxu1  ;;  %v1172_v34 = vpop.f32.mrf.mxu0  ;;  %2154 = vmatmul.mubr.bf16.gmra.mxu1 %v4641_v6  ;;  %2267 = vmatmul.mubr.bf16.gmra.mxu0 %v4643_v7  ;;  %v1238_v52 = vmax.f32 %v1169_v18, 0.0  ;;  %v3865_v18 = vld [vmem:[%s5091_s7 + $0x18c] ss:$16 sps:$4 sm:$0xff]  }
 0x290   : > { %v1060_v39 = vadd.f32 %v1059_v33, %v4436_v35  ;;  %v1173_v40 = vadd.f32 %v1172_v34, %v4440_v36  ;;  %2324 = vmatpush2.bf16.msra.mxu1 %v3845_v3  ;;  %v1239_v42 = vmax.f32 %v1058_v19, 0.0  ;;  %v1241_v43 = vmax.f32 %v1171_v20, 0.0  ;;  %2437 = vmatpush2.bf16.msra.mxu0 %v3848_v16 }
 0x291   : > { %v1063_v44 = vpop.f32.mrf.mxu1  ;;  %v1176_v15 = vpop.f32.mrf.mxu0  ;;  %2325 = vmatprep.subr.bf16.mxu1 %v3853_v17  ;;  %2438 = vmatprep.subr.bf16.mxu0 %v3856_v21  ;;  %v3860_v17 = vld [vmem:[%s5091_s7 + $0x3a8] ss:$16 sps:$4 sm:$0xff]  }
 0x292   : > { %v1240_v53 = vmax.f32 %v1060_v39, 0.0  ;;  %v1242_v54 = vmax.f32 %v1173_v40, 0.0  ;;  %v4685_v3 = vpack.c.bf16 %v1239_v42, %v1235_v55  ;;  %v4687_v8 = vpack.c.bf16 %v1241_v43, %v1237_v56  ;;  %v3863_v42 = vld [vmem:[%s5091_s7 + $0x188] ss:$16 sps:$4 sm:$0xff]  }
 0x293   : > { %v1065_v57 = vpop.f32.mrf.mxu1  ;;  %v1178_v58 = vpop.f32.mrf.mxu0  ;;  %v1064_v32 = vadd.f32 %v1063_v44, %v4444_v37  ;;  %v1177_v33 = vadd.f32 %v1176_v15, %v4448_v38 }
 0x294   : > { %v4678_v60 = vpack.c.bf16 %v1240_v53, %v1236_v50  ;;  %v4680_v61 = vpack.c.bf16 %v1242_v54, %v1238_v52  ;;  %2326 = vmatpush2.bf16.msra.mxu1 %v3851_v41  ;;  %v1066_v9 = vadd.f32 %v1065_v57, %v4436_v35  ;;  %2439 = vmatpush2.bf16.msra.mxu0 %v3854_v46  ;;  %v3871_v50 = vld [vmem:[%s5091_s7 + $0x16c] ss:$16 sps:$4 sm:$0xff]  }
 0x295   : > { %v1067_v13 = vpop.f32.mrf.mxu1  ;;  %v1180_v16 = vpop.f32.mrf.mxu0  ;;  %2327 = vmatprep.subr.bf16.mxu1 %v3859_v49  ;;  %v1179_v19 = vadd.f32 %v1178_v58, %v4440_v36  ;;  %2440 = vmatprep.subr.bf16.mxu0 %v3862_v59  ;;  %v3866_v49 = vld [vmem:[%s5091_s7 + $0x388] ss:$16 sps:$4 sm:$0xff]   ;;  %v1243_v56 = vmax.f32 %v1064_v32, 0.0  ;;  %v1245_v57 = vmax.f32 %v1177_v33, 0.0  ;;  %v3877_v32 = vld [vmem:[%s5091_s7 + $0x14c] ss:$16 sps:$4 sm:$0xff]  }
 0x296   : > { %v1068_v20 = vadd.f32 %v1067_v13, %v4444_v37  ;;  %v1181_v21 = vadd.f32 %v1180_v16, %v4448_v38  ;;  %2163 = vmatprep.mubr.bf16.mxu1 %v4678_v60  ;;  %2276 = vmatprep.mubr.bf16.mxu0 %v4680_v61  ;;  %v1244_v52 = vmax.f32 %v1066_v9, 0.0  ;;  %v3869_v9 = vld [vmem:[%s5091_s7 + $0x168] ss:$16 sps:$4 sm:$0xff]  }
 0x297   : > { %v1069_v34 = vpop.f32.mrf.mxu1  ;;  %v1182_v39 = vpop.f32.mrf.mxu0  ;;  %2164 = vmatmul.mubr.bf16.gmra.mxu1 %v4685_v3  ;;  %2277 = vmatmul.mubr.bf16.gmra.mxu0 %v4687_v8  ;;  %v1246_v53 = vmax.f32 %v1179_v19, 0.0 }
 0x298   : > { %v1070_v40 = vadd.f32 %v1069_v34, %v4436_v35  ;;  %v1183_v41 = vadd.f32 %v1182_v39, %v4440_v36  ;;  %2328 = vmatpush2.bf16.msra.mxu1 %v3857_v62  ;;  %v1247_v43 = vmax.f32 %v1068_v20, 0.0  ;;  %v1249_v44 = vmax.f32 %v1181_v21, 0.0  ;;  %2441 = vmatpush2.bf16.msra.mxu0 %v3860_v17  ;;  %v3874_v62 = vld [vmem:[%s5091_s7 + $0x36c] ss:$16 sps:$4 sm:$0xff]  }
 0x299   : > { %v1073_v15 = vpop.f32.mrf.mxu1  ;;  %v1186_v46 = vpop.f32.mrf.mxu0  ;;  %2329 = vmatprep.subr.bf16.mxu1 %v3865_v18  ;;  %2442 = vmatprep.subr.bf16.mxu0 %v3868_v24  ;;  %v3872_v24 = vld [vmem:[%s5091_s7 + $0x368] ss:$16 sps:$4 sm:$0xff]  }
 0x29a   : > { %v1248_v54 = vmax.f32 %v1070_v40, 0.0  ;;  %v1250_v55 = vmax.f32 %v1183_v41, 0.0  ;;  %v4729_v17 = vpack.c.bf16 %v1247_v43, %v1243_v56  ;;  %v4731_v18 = vpack.c.bf16 %v1249_v44, %v1245_v57  ;;  %v3880_v40 = vld [vmem:[%s5091_s7 + $0x34c] ss:$16 sps:$4 sm:$0xff]  }
 0x29b   : > { %v1075_v58 = vpop.f32.mrf.mxu1  ;;  %v1188_v59 = vpop.f32.mrf.mxu0  ;;  %v1074_v41 = vadd.f32 %v1073_v15, %v4444_v37  ;;  %v1187_v44 = vadd.f32 %v1186_v46, %v4448_v38  ;;  %v3878_v15 = vld [vmem:[%s5091_s7 + $0x348] ss:$16 sps:$4 sm:$0xff]   ;;  %v3886_v56 = vld [vmem:[%s5091_s7 + $0x32c] ss:$16 sps:$4 sm:$0xff]  }
 0x29c   : > { %v4722_v13 = vpack.c.bf16 %v1248_v54, %v1244_v52  ;;  %v4724_v16 = vpack.c.bf16 %v1250_v55, %v1246_v53  ;;  %2330 = vmatpush2.bf16.msra.mxu1 %v3863_v42  ;;  %v1076_v19 = vadd.f32 %v1075_v58, %v4436_v35  ;;  %2443 = vmatpush2.bf16.msra.mxu0 %v3866_v49  ;;  %v3875_v52 = vld [vmem:[%s5091_s7 + $0x148] ss:$16 sps:$4 sm:$0xff]  }
 0x29d   : > { %v1077_v20 = vpop.f32.mrf.mxu1  ;;  %v1190_v21 = vpop.f32.mrf.mxu0  ;;  %2331 = vmatprep.subr.bf16.mxu1 %v3871_v50  ;;  %v1189_v33 = vadd.f32 %v1188_v59, %v4440_v36  ;;  %2444 = vmatprep.subr.bf16.mxu0 %v3874_v62  ;;  %v1251_v55 = vmax.f32 %v1074_v41, 0.0  ;;  %v1253_v57 = vmax.f32 %v1187_v44, 0.0  ;;  %v3881_v62 = vld [vmem:[%s5091_s7 + $0x128] ss:$16 sps:$4 sm:$0xff]   ;;  %v3908_v41 = vld [vmem:[%s5093_s9] sm:$0xff]  }
 0x29e   : > { %v1078_v34 = vadd.f32 %v1077_v20, %v4444_v37  ;;  %v1191_v39 = vadd.f32 %v1190_v21, %v4448_v38  ;;  %2173 = vmatprep.mubr.bf16.mxu1 %v4722_v13  ;;  %2286 = vmatprep.mubr.bf16.mxu0 %v4724_v16  ;;  %v1252_v53 = vmax.f32 %v1076_v19, 0.0  ;;  %v3884_v19 = vld [vmem:[%s5091_s7 + $0x328] ss:$16 sps:$4 sm:$0xff]   ;;  %v3889_v21 = vld [vmem:[%s5091_s7 + $0x10c] ss:$16 sps:$4 sm:$0xff]  }
 0x29f   : > { %v1079_v42 = vpop.f32.mrf.mxu1  ;;  %v1192_v43 = vpop.f32.mrf.mxu0  ;;  %2174 = vmatmul.mubr.bf16.gmra.mxu1 %v4729_v17  ;;  %2287 = vmatmul.mubr.bf16.gmra.mxu0 %v4731_v18 }
 0x2a0   : > { %v1080_v49 = vadd.f32 %v1079_v42, %v4436_v35  ;;  %v1193_v50 = vadd.f32 %v1192_v43, %v4440_v36  ;;  %2332 = vmatpush2.bf16.msra.mxu1 %v3869_v9  ;;  %v1255_v37 = vmax.f32 %v1078_v34, 0.0  ;;  %2445 = vmatpush2.bf16.msra.mxu0 %v3872_v24  ;;  %v3883_v35 = vld [vmem:[%s5091_s7 + $0x12c] ss:$16 sps:$4 sm:$0xff]   ;;  %v1254_v36 = vmax.f32 %v1189_v33, 0.0  ;;  %v3890_v33 = vld [vmem:[%s5091_s7 + $0x308] ss:$16 sps:$4 sm:$0xff]  }
 0x2a1   : > { %2333 = vmatprep.subr.bf16.mxu1 %v3877_v32  ;;  %v1257_v38 = vmax.f32 %v1191_v39, 0.0  ;;  %2446 = vmatprep.subr.bf16.mxu0 %v3880_v40  ;;  %v3892_v24 = vld [vmem:[%s5091_s7 + $0x30c] ss:$16 sps:$4 sm:$0xff]   ;;  %v3887_v32 = vld [vmem:[%s5091_s7 + $0x108] ss:$16 sps:$4 sm:$0xff]   ;;  %v3895_v39 = vld [vmem:[%s5093_s9 + $0x70] sm:$0xff]  }
 0x2a2   : > { %v1256_v46 = vmax.f32 %v1080_v49, 0.0  ;;  %v1258_v54 = vmax.f32 %v1193_v50, 0.0  ;;  %v4773_v9 = vpack.c.bf16 %v1255_v37, %v1251_v55  ;;  %v3893_v34 = vld [vmem:[%s5093_s9 + $0x78] sm:$0xff]   ;;  %v3897_v40 = vld [vmem:[%s5093_s9 + $0x68] sm:$0xff]   ;;  %v3911_v42 = vld [vmem:[%s5093_s9 + $0xf0] sm:$0xff]  }
 0x2a3   : > { %v4778_v20 = vpack.c.bf16 %v1257_v38, %v1253_v57 }
 0x2a4   : > { %v4766_v58 = vpack.c.bf16 %v1256_v46, %v1252_v53  ;;  %v4768_v59 = vpack.c.bf16 %v1258_v54, %v1254_v36  ;;  %2334 = vmatpush2.bf16.msra.mxu1 %v3875_v52  ;;  %2447 = vmatpush2.bf16.msra.mxu0 %v3878_v15 }
 0x2a5   : > { %2335 = vmatprep.subr.bf16.mxu1 %v3883_v35  ;;  %2448 = vmatprep.subr.bf16.mxu0 %v3886_v56 }
 0x2a6   : > { %2183 = vmatprep.mubr.bf16.mxu1 %v4766_v58  ;;  %2296 = vmatprep.mubr.bf16.mxu0 %v4768_v59 }
 0x2a7   : > { %2184 = vmatmul.mubr.bf16.gmra.mxu1 %v4773_v9  ;;  %2297 = vmatmul.mubr.bf16.gmra.mxu0 %v4778_v20 }
 0x2a8   : > { %2336 = vmatpush2.bf16.msra.mxu1 %v3881_v62  ;;  %2339 = vmatprep.mubr.bf16.mxu1 %v4458_v0  ;;  %v3894_v0 = vld [vmem:[%s5093_s9 + $0x38] sm:$0xff]  }
 0x2a9   : > { %2449 = vmatpush2.bf16.msra.mxu0 %v3884_v19  ;;  %2452 = vmatprep.mubr.bf16.mxu0 %v4460_v1  ;;  %v3896_v1 = vld [vmem:[%s5093_s9 + $0x30] sm:$0xff]  }
 0x2aa   : > { %2337 = vmatprep.subr.bf16.mxu1 %v3889_v21  ;;  %2450 = vmatprep.subr.bf16.mxu0 %v3892_v24 }
 0x2ac   : > { %2338 = vmatpush2.bf16.msra.mxu1 %v3887_v32 }
 0x2ad   : > { %2451 = vmatpush2.bf16.msra.mxu0 %v3890_v33  ;;  %3506 = vmatprep.subr.bf16.mxu1 %v3893_v34 }
 0x2af   : > { %2340 = vmatmul.mubr.bf16.vlgmr.msra.gmra.mxu1 %v4468_v4  ;;  %v3898_v4 = vld [vmem:[%s5093_s9 + $0x28] sm:$0xff]  }
 0x2b0   : > { %2453 = vmatmul.mubr.bf16.vlgmr.msra.gmra.mxu0 %v4470_v5  ;;  %2349 = vmatprep.mubr.bf16.mxu1 %v4502_v45  ;;  %v3899_v5 = vld [vmem:[%s5093_s9 + $0x60] sm:$0xff]  }
 0x2b1   : > { %2462 = vmatprep.mubr.bf16.mxu0 %v4511_v51  ;;  %3507 = vmatpush3.bf16.msra.mxu1 %v3894_v0  ;;  %v3900_v45 = vld [vmem:[%s5093_s9 + $0x20] sm:$0xff]   ;;  %v3901_v51 = vld [vmem:[%s5093_s9 + $0x58] sm:$0xff]  }
 0x2b2   : > { %3508 = vmatprep.subr.bf16.mxu1 %v3895_v39 }
 0x2b5   : > { %3509 = vmatpush3.bf16.msra.mxu1 %v3896_v1 }
 0x2b6   : > { %3510 = vmatprep.subr.bf16.mxu1 %v3897_v40 }
 0x2b7   : > { %2350 = vmatmul.mubr.bf16.gmra.mxu1 %v4507_v47  ;;  %v3902_v47 = vld [vmem:[%s5093_s9 + $0x18] sm:$0xff]  }
 0x2b8   : > { %2463 = vmatmul.mubr.bf16.gmra.mxu0 %v4509_v48  ;;  %2359 = vmatprep.mubr.bf16.mxu1 %v4546_v22  ;;  %v3903_v48 = vld [vmem:[%s5093_s9 + $0x50] sm:$0xff]  }
 0x2b9   : > { %2472 = vmatprep.mubr.bf16.mxu0 %v4548_v23  ;;  %3511 = vmatpush3.bf16.msra.mxu1 %v3898_v4  ;;  %v3904_v22 = vld [vmem:[%s5093_s9 + $0x10] sm:$0xff]   ;;  %v3905_v23 = vld [vmem:[%s5093_s9 + $0x48] sm:$0xff]  }
 0x2ba   : > { %3512 = vmatprep.subr.bf16.mxu1 %v3899_v5 }
 0x2bd   : > { %3513 = vmatpush3.bf16.msra.mxu1 %v3900_v45 }
 0x2be   : > { %3514 = vmatprep.subr.bf16.mxu1 %v3901_v51 }
 0x2bf   : > { %2360 = vmatmul.mubr.bf16.gmra.mxu1 %v4553_v25  ;;  %v3909_v25 = vld [vmem:[%s5093_s9 + $0xf8] sm:$0xff]  }
 0x2c0   : > { %2473 = vmatmul.mubr.bf16.gmra.mxu0 %v4555_v26  ;;  %2369 = vmatprep.mubr.bf16.mxu1 %v4590_v10  ;;  %v3910_v26 = vld [vmem:[%s5093_s9 + $0xb8] sm:$0xff]   ;;  %v3906_v10 = vld [vmem:[%s5093_s9 + $0x8] sm:$0xff]  }
 0x2c1   : > { %2482 = vmatprep.mubr.bf16.mxu0 %v4592_v11  ;;  %3515 = vmatpush3.bf16.msra.mxu1 %v3902_v47  ;;  %v3907_v11 = vld [vmem:[%s5093_s9 + $0x40] sm:$0xff]  }
 0x2c2   : > { %3516 = vmatprep.subr.bf16.mxu1 %v3903_v48  ;;  %3570 = vmatprep.subr.bf16.mxu0 %v3909_v25 }
 0x2c3   : > { %3571 = vmatpush3.bf16.msra.mxu0 %v3910_v26 }
 0x2c4   : > { %3572 = vmatprep.subr.bf16.mxu0 %v3911_v42 }
 0x2c5   : > { %3517 = vmatpush3.bf16.msra.mxu1 %v3904_v22 }
 0x2c6   : > { %3518 = vmatprep.subr.bf16.mxu1 %v3905_v23 }
 0x2c7   : > { %2370 = vmatmul.mubr.bf16.gmra.mxu1 %v4597_v12  ;;  %v3912_v12 = vld [vmem:[%s5093_s9 + $0xb0] sm:$0xff]  }
 0x2c8   : > { %2483 = vmatmul.mubr.bf16.gmra.mxu0 %v4599_v14  ;;  %2379 = vmatprep.mubr.bf16.mxu1 %v4634_v63  ;;  %v3913_v14 = vld [vmem:[%s5093_s9 + $0xe8] sm:$0xff]  }
 0x2c9   : > { %2492 = vmatprep.mubr.bf16.mxu0 %v4636_v2  ;;  %3519 = vmatpush3.bf16.msra.mxu1 %v3906_v10  ;;  %v3914_v63 = vld [vmem:[%s5093_s9 + $0xa8] sm:$0xff]   ;;  %v3915_v2 = vld [vmem:[%s5093_s9 + $0xe0] sm:$0xff]  }
 0x2ca   : > { %3520 = vmatprep.subr.bf16.mxu1 %v3907_v11  ;;  %3573 = vmatpush3.bf16.msra.mxu0 %v3912_v12 }
 0x2cb   : > { %3574 = vmatprep.subr.bf16.mxu0 %v3913_v14 }
 0x2cd   : > { %3521 = vmatpush3.bf16.msra.mxu1 %v3908_v41 }
 0x2ce   : > { %3575 = vmatpush3.bf16.msra.mxu0 %v3914_v63 }
 0x2cf   : > { %2380 = vmatmul.mubr.bf16.gmra.mxu1 %v4641_v6  ;;  %v3916_v6 = vld [vmem:[%s5093_s9 + $0xa0] sm:$0xff]   ;;  %3576 = vmatprep.subr.bf16.mxu0 %v3915_v2 }
 0x2d0   : > { %2493 = vmatmul.mubr.bf16.gmra.mxu0 %v4643_v7  ;;  %2389 = vmatprep.mubr.bf16.mxu1 %v4678_v60  ;;  %v3917_v7 = vld [vmem:[%s5093_s9 + $0xd8] sm:$0xff]  }
 0x2d1   : > { %2502 = vmatprep.mubr.bf16.mxu0 %v4680_v61  ;;  %v3918_v60 = vld [vmem:[%s5093_s9 + $0x98] sm:$0xff]   ;;  %v3919_v61 = vld [vmem:[%s5093_s9 + $0xd0] sm:$0xff]  }
 0x2d2   : > { %3577 = vmatpush3.bf16.msra.mxu0 %v3916_v6 }
 0x2d3   : > { %3578 = vmatprep.subr.bf16.mxu0 %v3917_v7 }
 0x2d6   : > { %3579 = vmatpush3.bf16.msra.mxu0 %v3918_v60 }
 0x2d7   : > { %2390 = vmatmul.mubr.bf16.gmra.mxu1 %v4685_v3  ;;  %v3920_v3 = vld [vmem:[%s5093_s9 + $0x90] sm:$0xff]   ;;  %3580 = vmatprep.subr.bf16.mxu0 %v3919_v61 }
 0x2d8   : > { %2503 = vmatmul.mubr.bf16.gmra.mxu0 %v4687_v8  ;;  %2399 = vmatprep.mubr.bf16.mxu1 %v4722_v13  ;;  %v3921_v8 = vld [vmem:[%s5093_s9 + $0xc8] sm:$0xff]  }
 0x2d9   : > { %2512 = vmatprep.mubr.bf16.mxu0 %v4724_v16  ;;  %v3922_v13 = vld [vmem:[%s5093_s9 + $0x88] sm:$0xff]   ;;  %v3923_v16 = vld [vmem:[%s5093_s9 + $0xc0] sm:$0xff]  }
 0x2da   : > { %3581 = vmatpush3.bf16.msra.mxu0 %v3920_v3 }
 0x2db   : > { %3582 = vmatprep.subr.bf16.mxu0 %v3921_v8 }
 0x2de   : > { %3583 = vmatpush3.bf16.msra.mxu0 %v3922_v13 }
 0x2df   : > { %2400 = vmatmul.mubr.bf16.gmra.mxu1 %v4729_v17  ;;  %v3924_v17 = vld [vmem:[%s5093_s9 + $0x80] sm:$0xff]   ;;  %3584 = vmatprep.subr.bf16.mxu0 %v3923_v16 }
 0x2e0   : > { %2513 = vmatmul.mubr.bf16.gmra.mxu0 %v4731_v18  ;;  %2409 = vmatprep.mubr.bf16.mxu1 %v4766_v58  ;;  %v4927_v18 = vld [vmem:[%s5092_s8] sm:$0xf] }
 0x2e1   : > { %2522 = vmatprep.mubr.bf16.mxu0 %v4768_v59  ;;  %v4932_v43 = vrot.slane %v4927_v18, %v907_v28  ;;  %v4937_v44 = vrot.slane %v4927_v18, %v903_v30 }
 0x2e2   : > { %3585 = vmatpush3.bf16.msra.mxu0 %v3924_v17 }
 0x2e7   : > { %2410 = vmatmul.mubr.bf16.gmra.mxu1 %v4773_v9 }
 0x2e8   : > { %2523 = vmatmul.mubr.bf16.gmra.mxu0 %v4778_v20 }
 0x32f   : > { %v2115_v49 = vpop.f32.mrf.mxu1  ;;  %v2228_v50 = vpop.f32.mrf.mxu0 }
 0x330   : > { %v2116_v15 = vadd.f32 %v2115_v49, %v4937_v44 }
 0x331   : > { %v2117_v52 = vpop.f32.mrf.mxu1  ;;  %v2230_v53 = vpop.f32.mrf.mxu0 }
 0x332   : > { %v2118_v37 = vadd.f32 %v2117_v52, %v4932_v43  ;;  %v2229_v30 = vadd.f32 %v2228_v50, %v2116_v15 }
 0x333   : > { %v2119_v35 = vpop.f32.mrf.mxu1  ;;  %v2232_v36 = vpop.f32.mrf.mxu0 }
 0x334   : > { %v2120_v38 = vadd.f32 %v2119_v35, %v4937_v44  ;;  %v2231_v54 = vadd.f32 %v2230_v53, %v2118_v37  ;;  %v2533_v32 = vmax.f32 %v2229_v30, 0.0 }
 0x335   : > { %v2121_v46 = vpop.f32.mrf.mxu1  ;;  %v2234_v28 = vpop.f32.mrf.mxu0 }
 0x336   : > { %v2233_v55 = vadd.f32 %v2232_v36, %v2120_v38  ;;  %v2122_v56 = vadd.f32 %v2121_v46, %v4932_v43  ;;  %v2534_v19 = vmax.f32 %v2231_v54, 0.0 }
 0x337   : > { %v2125_v57 = vpop.f32.mrf.mxu1  ;;  %v2238_v59 = vpop.f32.mrf.mxu0 }
 0x338   : > { %v2235_v58 = vadd.f32 %v2234_v28, %v2122_v56  ;;  %v2537_v62 = vmax.f32 %v2233_v55, 0.0  ;;  %v2126_v33 = vadd.f32 %v2125_v57, %v4937_v44 }
 0x339   : > { %v2127_v9 = vpop.f32.mrf.mxu1  ;;  %v2240_v24 = vpop.f32.mrf.mxu0 }
 0x33a   : > { %v2538_v20 = vmax.f32 %v2235_v58, 0.0  ;;  %v2128_v21 = vadd.f32 %v2127_v9, %v4932_v43  ;;  %v2597_v40 = vpack.c.bf16 %v2537_v62, %v2533_v32  ;;  %v2239_v48 = vadd.f32 %v2238_v59, %v2126_v33 }
 0x33b   : > { %v2129_v34 = vpop.f32.mrf.mxu1  ;;  %v2242_v1 = vpop.f32.mrf.mxu0 }
 0x33c   : > { %v2598_v0 = vpack.c.bf16 %v2538_v20, %v2534_v19  ;;  %v2130_v39 = vadd.f32 %v2129_v34, %v4937_v44  ;;  %v2241_v5 = vadd.f32 %v2240_v24, %v2128_v21  ;;  %v2541_v14 = vmax.f32 %v2239_v48, 0.0 }
 0x33d   : > { %v2131_v4 = vpop.f32.mrf.mxu1  ;;  %v2244_v47 = vpop.f32.mrf.mxu0 }
 0x33e   : > { %v2243_v45 = vadd.f32 %v2242_v1, %v2130_v39  ;;  %v2132_v51 = vadd.f32 %v2131_v4, %v4932_v43  ;;  %2924 = vmatprep.mubr.bf16.mxu1 %v2598_v0  ;;  %v2542_v11 = vmax.f32 %v2241_v5, 0.0 }
 0x33f   : > { %v2135_v22 = vpop.f32.mrf.mxu1  ;;  %2925 = vmatmul.mubr.bf16.vlgmr.msra.gmra.mxu1 %v2597_v40  ;;  %v2248_v25 = vpop.f32.mrf.mxu0 }
 0x340   : > { %v2245_v23 = vadd.f32 %v2244_v47, %v2132_v51  ;;  %v2545_v26 = vmax.f32 %v2243_v45, 0.0  ;;  %v2136_v63 = vadd.f32 %v2135_v22, %v4937_v44 }
 0x341   : > { %v2137_v10 = vpop.f32.mrf.mxu1  ;;  %v2250_v12 = vpop.f32.mrf.mxu0 }
 0x342   : > { %v2546_v41 = vmax.f32 %v2245_v23, 0.0  ;;  %v2138_v42 = vadd.f32 %v2137_v10, %v4932_v43  ;;  %v2601_v61 = vpack.c.bf16 %v2545_v26, %v2541_v14  ;;  %v2249_v49 = vadd.f32 %v2248_v25, %v2136_v63 }
 0x343   : > { %v2139_v2 = vpop.f32.mrf.mxu1  ;;  %v2252_v60 = vpop.f32.mrf.mxu0 }
 0x344   : > { %v2602_v6 = vpack.c.bf16 %v2546_v41, %v2542_v11  ;;  %v2140_v7 = vadd.f32 %v2139_v2, %v4937_v44  ;;  %v2251_v8 = vadd.f32 %v2250_v12, %v2138_v42  ;;  %v2549_v28 = vmax.f32 %v2249_v49, 0.0 }
 0x345   : > { %v2141_v3 = vpop.f32.mrf.mxu1  ;;  %v2254_v17 = vpop.f32.mrf.mxu0 }
 0x346   : > { %v2253_v13 = vadd.f32 %v2252_v60, %v2140_v7  ;;  %v2142_v16 = vadd.f32 %v2141_v3, %v4932_v43  ;;  %2932 = vmatprep.mubr.bf16.mxu1 %v2602_v6  ;;  %v2550_v35 = vmax.f32 %v2251_v8, 0.0 }
 0x347   : > { %v2145_v50 = vpop.f32.mrf.mxu1  ;;  %2933 = vmatmul.mubr.bf16.gmra.mxu1 %v2601_v61  ;;  %v2258_v53 = vpop.f32.mrf.mxu0 }
 0x348   : > { %v2255_v52 = vadd.f32 %v2254_v17, %v2142_v16  ;;  %v2553_v37 = vmax.f32 %v2253_v13, 0.0  ;;  %v2146_v54 = vadd.f32 %v2145_v50, %v4937_v44 }
 0x349   : > { %v2147_v15 = vpop.f32.mrf.mxu1  ;;  %v2260_v46 = vpop.f32.mrf.mxu0 }
 0x34a   : > { %v2554_v36 = vmax.f32 %v2255_v52, 0.0  ;;  %v2148_v38 = vadd.f32 %v2147_v15, %v4932_v43  ;;  %v2605_v58 = vpack.c.bf16 %v2553_v37, %v2549_v28  ;;  %v2259_v21 = vadd.f32 %v2258_v53, %v2146_v54 }
 0x34b   : > { %v2149_v55 = vpop.f32.mrf.mxu1  ;;  %v2262_v57 = vpop.f32.mrf.mxu0 }
 0x34c   : > { %v2606_v56 = vpack.c.bf16 %v2554_v36, %v2550_v35  ;;  %v2150_v30 = vadd.f32 %v2149_v55, %v4937_v44  ;;  %v2261_v62 = vadd.f32 %v2260_v46, %v2148_v38  ;;  %v2557_v5 = vmax.f32 %v2259_v21, 0.0 }
 0x34d   : > { %v2151_v59 = vpop.f32.mrf.mxu1  ;;  %v2264_v20 = vpop.f32.mrf.mxu0 }
 0x34e   : > { %v2263_v9 = vadd.f32 %v2262_v57, %v2150_v30  ;;  %v2152_v19 = vadd.f32 %v2151_v59, %v4932_v43  ;;  %2940 = vmatprep.mubr.bf16.mxu1 %v2606_v56  ;;  %v2558_v39 = vmax.f32 %v2261_v62, 0.0 }
 0x34f   : > { %v2155_v24 = vpop.f32.mrf.mxu1  ;;  %2941 = vmatmul.mubr.bf16.gmra.mxu1 %v2605_v58  ;;  %v2268_v33 = vpop.f32.mrf.mxu0 }
 0x350   : > { %v2265_v32 = vadd.f32 %v2264_v20, %v2152_v19  ;;  %v2561_v34 = vmax.f32 %v2263_v9, 0.0  ;;  %v2156_v45 = vadd.f32 %v2155_v24, %v4937_v44 }
 0x351   : > { %v2157_v0 = vpop.f32.mrf.mxu1  ;;  %v2270_v4 = vpop.f32.mrf.mxu0 }
 0x352   : > { %v2562_v1 = vmax.f32 %v2265_v32, 0.0  ;;  %v2158_v40 = vadd.f32 %v2157_v0, %v4932_v43  ;;  %v2609_v23 = vpack.c.bf16 %v2561_v34, %v2557_v5  ;;  %v2269_v42 = vadd.f32 %v2268_v33, %v2156_v45 }
 0x353   : > { %v2159_v51 = vpop.f32.mrf.mxu1  ;;  %v2272_v22 = vpop.f32.mrf.mxu0 }
 0x354   : > { %v2610_v47 = vpack.c.bf16 %v2562_v1, %v2558_v39  ;;  %v2160_v48 = vadd.f32 %v2159_v51, %v4937_v44  ;;  %v2271_v26 = vadd.f32 %v2270_v4, %v2158_v40  ;;  %v2565_v8 = vmax.f32 %v2269_v42, 0.0 }
 0x355   : > { %v2161_v25 = vpop.f32.mrf.mxu1  ;;  %v2274_v41 = vpop.f32.mrf.mxu0 }
 0x356   : > { %v2273_v10 = vadd.f32 %v2272_v22, %v2160_v48  ;;  %v2162_v11 = vadd.f32 %v2161_v25, %v4932_v43  ;;  %2948 = vmatprep.mubr.bf16.mxu1 %v2610_v47  ;;  %v2566_v7 = vmax.f32 %v2271_v26, 0.0 }
 0x357   : > { %v2165_v12 = vpop.f32.mrf.mxu1  ;;  %2949 = vmatmul.mubr.bf16.gmra.mxu1 %v2609_v23  ;;  %v2278_v63 = vpop.f32.mrf.mxu0 }
 0x358   : > { %v2275_v14 = vadd.f32 %v2274_v41, %v2162_v11  ;;  %v2569_v2 = vmax.f32 %v2273_v10, 0.0  ;;  %v2166_v13 = vadd.f32 %v2165_v12, %v4937_v44 }
 0x359   : > { %v2167_v6 = vpop.f32.mrf.mxu1  ;;  %v2280_v3 = vpop.f32.mrf.mxu0 }
 0x35a   : > { %v2570_v60 = vmax.f32 %v2275_v14, 0.0  ;;  %v2168_v61 = vadd.f32 %v2167_v6, %v4932_v43  ;;  %v2613_v52 = vpack.c.bf16 %v2569_v2, %v2565_v8  ;;  %v2279_v38 = vadd.f32 %v2278_v63, %v2166_v13 }
 0x35b   : > { %v2169_v16 = vpop.f32.mrf.mxu1  ;;  %v2282_v50 = vpop.f32.mrf.mxu0  ;;  %v4979_v8 = vrot.slane %v4927_v18, %v911_v31 }
 0x35c   : > { %v2614_v17 = vpack.c.bf16 %v2570_v60, %v2566_v7  ;;  %v2170_v49 = vadd.f32 %v2169_v16, %v4937_v44  ;;  %v2281_v37 = vadd.f32 %v2280_v3, %v2168_v61  ;;  %v2573_v62 = vmax.f32 %v2279_v38, 0.0 }
 0x35d   : > { %v2171_v53 = vpop.f32.mrf.mxu1  ;;  %v2284_v36 = vpop.f32.mrf.mxu0  ;;  %v4974_v61 = vrot.slane %v4927_v18, %v915_v29 }
 0x35e   : > { %v2283_v15 = vadd.f32 %v2282_v50, %v2170_v49  ;;  %v2172_v35 = vadd.f32 %v2171_v53, %v4932_v43  ;;  %2956 = vmatprep.mubr.bf16.mxu1 %v2614_v17  ;;  %v2574_v30 = vmax.f32 %v2281_v37, 0.0 }
 0x35f   : > { %v2175_v46 = vpop.f32.mrf.mxu1  ;;  %2957 = vmatmul.mubr.bf16.gmra.mxu1 %v2613_v52  ;;  %v2288_v54 = vpop.f32.mrf.mxu0 }
 0x360   : > { %v2285_v28 = vadd.f32 %v2284_v36, %v2172_v35  ;;  %v2577_v55 = vmax.f32 %v2283_v15, 0.0  ;;  %v2176_v9 = vadd.f32 %v2175_v46, %v4937_v44 }
 0x361   : > { %v2177_v56 = vpop.f32.mrf.mxu1  ;;  %v2290_v59 = vpop.f32.mrf.mxu0 }
 0x362   : > { %v2578_v57 = vmax.f32 %v2285_v28, 0.0  ;;  %v2178_v58 = vadd.f32 %v2177_v56, %v4932_v43  ;;  %v2617_v32 = vpack.c.bf16 %v2577_v55, %v2573_v62  ;;  %v2289_v40 = vadd.f32 %v2288_v54, %v2176_v9 }
 0x363   : > { %v2179_v19 = vpop.f32.mrf.mxu1  ;;  %v2292_v24 = vpop.f32.mrf.mxu0 }
 0x364   : > { %v2618_v20 = vpack.c.bf16 %v2578_v57, %v2574_v30  ;;  %v2180_v21 = vadd.f32 %v2179_v19, %v4937_v44  ;;  %v2291_v34 = vadd.f32 %v2290_v59, %v2178_v58  ;;  %v2581_v26 = vmax.f32 %v2289_v40, 0.0 }
 0x365   : > { %v2181_v33 = vpop.f32.mrf.mxu1  ;;  %v2294_v1 = vpop.f32.mrf.mxu0 }
 0x366   : > { %v2293_v0 = vadd.f32 %v2292_v24, %v2180_v21  ;;  %v2182_v39 = vadd.f32 %v2181_v33, %v4932_v43  ;;  %2964 = vmatprep.mubr.bf16.mxu1 %v2618_v20  ;;  %v2582_v48 = vmax.f32 %v2291_v34, 0.0 }
 0x367   : > { %v2185_v4 = vpop.f32.mrf.mxu1  ;;  %2965 = vmatmul.mubr.bf16.gmra.mxu1 %v2617_v32  ;;  %v2298_v45 = vpop.f32.mrf.mxu0 }
 0x368   : > { %v2295_v5 = vadd.f32 %v2294_v1, %v2182_v39  ;;  %v2585_v51 = vmax.f32 %v2293_v0, 0.0  ;;  %v2186_v10 = vadd.f32 %v2185_v4, %v4937_v44 }
 0x369   : > { %v2187_v47 = vpop.f32.mrf.mxu1  ;;  %v2300_v25 = vpop.f32.mrf.mxu0 }
 0x36a   : > { %v2586_v22 = vmax.f32 %v2295_v5, 0.0  ;;  %v2188_v23 = vadd.f32 %v2187_v47, %v4932_v43  ;;  %v2621_v14 = vpack.c.bf16 %v2585_v51, %v2581_v26  ;;  %v2299_v3 = vadd.f32 %v2298_v45, %v2186_v10 }
 0x36b   : > { %v2189_v11 = vpop.f32.mrf.mxu1  ;;  %v2302_v12 = vpop.f32.mrf.mxu0 }
 0x36c   : > { %v2622_v41 = vpack.c.bf16 %v2586_v22, %v2582_v48  ;;  %v2190_v42 = vadd.f32 %v2189_v11, %v4937_v44  ;;  %v2301_v2 = vadd.f32 %v2300_v25, %v2188_v23  ;;  %v2589_v37 = vmax.f32 %v2299_v3, 0.0 }
 0x36d   : > { %v2191_v63 = vpop.f32.mrf.mxu1  ;;  %v2304_v60 = vpop.f32.mrf.mxu0 }
 0x36e   : > { %v2303_v6 = vadd.f32 %v2302_v12, %v2190_v42  ;;  %v2192_v7 = vadd.f32 %v2191_v63, %v4932_v43  ;;  %2972 = vmatprep.mubr.bf16.mxu1 %v2622_v41  ;;  %v2590_v43 = vmax.f32 %v2301_v2, 0.0 }
 0x36f   : > { %v2341_v44 = vpop.f32.mrf.mxu1  ;;  %2973 = vmatmul.mubr.bf16.gmra.mxu1 %v2621_v14 }
 0x370   : > { %v2305_v13 = vadd.f32 %v2304_v60, %v2192_v7  ;;  %v2454_v16 = vpop.f32.mrf.mxu0  ;;  %v2593_v17 = vmax.f32 %v2303_v6, 0.0  ;;  %v2342_v29 = vadd.f32 %v2341_v44, %v4979_v8 }
 0x371   : > { %v2343_v49 = vpop.f32.mrf.mxu1 }
 0x372   : > { %v2594_v50 = vmax.f32 %v2305_v13, 0.0  ;;  %v2344_v52 = vadd.f32 %v2343_v49, %v4974_v61  ;;  %v2456_v53 = vpop.f32.mrf.mxu0  ;;  %v2625_v18 = vpack.c.bf16 %v2593_v17, %v2589_v37  ;;  %v2455_v55 = vadd.f32 %v2454_v16, %v2342_v29 }
 0x373   : > { %v2345_v15 = vpop.f32.mrf.mxu1 }
 0x374   : > { %v2626_v35 = vpack.c.bf16 %v2594_v50, %v2590_v43  ;;  %v2346_v27 = vadd.f32 %v2345_v15, %v4979_v8  ;;  %v2458_v31 = vpop.f32.mrf.mxu0  ;;  %v2457_v38 = vadd.f32 %v2456_v53, %v2344_v52  ;;  %v2535_v21 = vmax.f32 %v2455_v55, 0.0 }
 0x375   : > { %v2347_v36 = vpop.f32.mrf.mxu1 }
 0x376   : > { %v2459_v46 = vadd.f32 %v2458_v31, %v2346_v27  ;;  %v2348_v28 = vadd.f32 %v2347_v36, %v4974_v61  ;;  %v2460_v54 = vpop.f32.mrf.mxu0  ;;  %2980 = vmatprep.mubr.bf16.mxu1 %v2626_v35  ;;  %v2536_v62 = vmax.f32 %v2457_v38, 0.0 }
 0x377   : > { %v2351_v56 = vpop.f32.mrf.mxu1  ;;  %2981 = vmatmul.mubr.bf16.gmra.mxu1 %v2625_v18 }
 0x378   : > { %v2461_v30 = vadd.f32 %v2460_v54, %v2348_v28  ;;  %v2464_v57 = vpop.f32.mrf.mxu0  ;;  %v2539_v58 = vmax.f32 %v2459_v46, 0.0  ;;  %v2352_v24 = vadd.f32 %v2351_v56, %v4979_v8 }
 0x379   : > { %v2353_v59 = vpop.f32.mrf.mxu1 }
 0x37a   : > { %v2540_v9 = vmax.f32 %v2461_v30, 0.0  ;;  %v2354_v19 = vadd.f32 %v2353_v59, %v4974_v61  ;;  %v2466_v20 = vpop.f32.mrf.mxu0  ;;  %v2599_v39 = vpack.c.bf16 %v2539_v58, %v2535_v21  ;;  %v2465_v51 = vadd.f32 %v2464_v57, %v2352_v24 }
 0x37b   : > { %v2355_v32 = vpop.f32.mrf.mxu1 }
 0x37c   : > { %v2600_v33 = vpack.c.bf16 %v2540_v9, %v2536_v62  ;;  %v2356_v34 = vadd.f32 %v2355_v32, %v4979_v8  ;;  %v2468_v0 = vpop.f32.mrf.mxu0  ;;  %v2467_v40 = vadd.f32 %v2466_v20, %v2354_v19  ;;  %v2543_v42 = vmax.f32 %v2465_v51, 0.0 }
 0x37d   : > { %v2357_v1 = vpop.f32.mrf.mxu1 }
 0x37e   : > { %v2469_v4 = vadd.f32 %v2468_v0, %v2356_v34  ;;  %v2358_v5 = vadd.f32 %v2357_v1, %v4974_v61  ;;  %v2470_v45 = vpop.f32.mrf.mxu0  ;;  %3021 = vmatprep.mubr.bf16.mxu0 %v2600_v33  ;;  %v2544_v26 = vmax.f32 %v2467_v40, 0.0 }
 0x37f   : > { %v2361_v47 = vpop.f32.mrf.mxu1  ;;  %3022 = vmatmul.mubr.bf16.vlgmr.msra.gmra.mxu0 %v2599_v39 }
 0x380   : > { %v2471_v48 = vadd.f32 %v2470_v45, %v2358_v5  ;;  %v2474_v22 = vpop.f32.mrf.mxu0  ;;  %v2547_v23 = vmax.f32 %v2469_v4, 0.0  ;;  %v2362_v12 = vadd.f32 %v2361_v47, %v4979_v8 }
 0x381   : > { %v2363_v25 = vpop.f32.mrf.mxu1 }
 0x382   : > { %v2548_v10 = vmax.f32 %v2471_v48, 0.0  ;;  %v2364_v11 = vadd.f32 %v2363_v25, %v4974_v61  ;;  %v2476_v41 = vpop.f32.mrf.mxu0  ;;  %v2603_v7 = vpack.c.bf16 %v2547_v23, %v2543_v42  ;;  %v2475_v17 = vadd.f32 %v2474_v22, %v2362_v12 }
 0x383   : > { %v2365_v14 = vpop.f32.mrf.mxu1 }
 0x384   : > { %v2604_v63 = vpack.c.bf16 %v2548_v10, %v2544_v26  ;;  %v2366_v2 = vadd.f32 %v2365_v14, %v4979_v8  ;;  %v2478_v6 = vpop.f32.mrf.mxu0  ;;  %v2477_v3 = vadd.f32 %v2476_v41, %v2364_v11  ;;  %v2551_v27 = vmax.f32 %v2475_v17, 0.0 }
 0x385   : > { %v2367_v60 = vpop.f32.mrf.mxu1 }
 0x386   : > { %v2479_v44 = vadd.f32 %v2478_v6, %v2366_v2  ;;  %v2368_v13 = vadd.f32 %v2367_v60, %v4974_v61  ;;  %v2480_v16 = vpop.f32.mrf.mxu0  ;;  %3029 = vmatprep.mubr.bf16.mxu0 %v2604_v63  ;;  %v2552_v37 = vmax.f32 %v2477_v3, 0.0 }
 0x387   : > { %v2371_v49 = vpop.f32.mrf.mxu1  ;;  %3030 = vmatmul.mubr.bf16.gmra.mxu0 %v2603_v7 }
 0x388   : > { %v2481_v43 = vadd.f32 %v2480_v16, %v2368_v13  ;;  %v2484_v50 = vpop.f32.mrf.mxu0  ;;  %v2555_v52 = vmax.f32 %v2479_v44, 0.0  ;;  %v2372_v31 = vadd.f32 %v2371_v49, %v4979_v8 }
 0x389   : > { %v2373_v53 = vpop.f32.mrf.mxu1 }
 0x38a   : > { %v2556_v29 = vmax.f32 %v2481_v43, 0.0  ;;  %v2374_v15 = vadd.f32 %v2373_v53, %v4974_v61  ;;  %v2486_v35 = vpop.f32.mrf.mxu0  ;;  %v2607_v28 = vpack.c.bf16 %v2555_v52, %v2551_v27  ;;  %v2485_v58 = vadd.f32 %v2484_v50, %v2372_v31 }
 0x38b   : > { %v2375_v18 = vpop.f32.mrf.mxu1 }
 0x38c   : > { %v2608_v36 = vpack.c.bf16 %v2556_v29, %v2552_v37  ;;  %v2376_v38 = vadd.f32 %v2375_v18, %v4979_v8  ;;  %v2488_v46 = vpop.f32.mrf.mxu0  ;;  %v2487_v55 = vadd.f32 %v2486_v35, %v2374_v15  ;;  %v2559_v34 = vmax.f32 %v2485_v58, 0.0 }
 0x38d   : > { %v2377_v54 = vpop.f32.mrf.mxu1 }
 0x38e   : > { %v2489_v56 = vadd.f32 %v2488_v46, %v2376_v38  ;;  %v2378_v30 = vadd.f32 %v2377_v54, %v4974_v61  ;;  %v2490_v57 = vpop.f32.mrf.mxu0  ;;  %3037 = vmatprep.mubr.bf16.mxu0 %v2608_v36  ;;  %v2560_v21 = vmax.f32 %v2487_v55, 0.0 }
 0x38f   : > { %v2381_v59 = vpop.f32.mrf.mxu1  ;;  %3038 = vmatmul.mubr.bf16.gmra.mxu0 %v2607_v28 }
 0x390   : > { %v2491_v62 = vadd.f32 %v2490_v57, %v2378_v30  ;;  %v2494_v9 = vpop.f32.mrf.mxu0  ;;  %v2563_v19 = vmax.f32 %v2489_v56, 0.0  ;;  %v2382_v0 = vadd.f32 %v2381_v59, %v4979_v8 }
 0x391   : > { %v2383_v20 = vpop.f32.mrf.mxu1 }
 0x392   : > { %v2564_v24 = vmax.f32 %v2491_v62, 0.0  ;;  %v2384_v32 = vadd.f32 %v2383_v20, %v4974_v61  ;;  %v2496_v33 = vpop.f32.mrf.mxu0  ;;  %v2611_v5 = vpack.c.bf16 %v2563_v19, %v2559_v34  ;;  %v2495_v23 = vadd.f32 %v2494_v9, %v2382_v0 }
 0x393   : > { %v2385_v39 = vpop.f32.mrf.mxu1 }
 0x394   : > { %v2612_v1 = vpack.c.bf16 %v2564_v24, %v2560_v21  ;;  %v2386_v40 = vadd.f32 %v2385_v39, %v4979_v8  ;;  %v2498_v4 = vpop.f32.mrf.mxu0  ;;  %v2497_v51 = vadd.f32 %v2496_v33, %v2384_v32  ;;  %v2567_v2 = vmax.f32 %v2495_v23, 0.0 }
 0x395   : > { %v2387_v45 = vpop.f32.mrf.mxu1 }
 0x396   : > { %v2499_v47 = vadd.f32 %v2498_v4, %v2386_v40  ;;  %v2388_v48 = vadd.f32 %v2387_v45, %v4974_v61  ;;  %v2500_v22 = vpop.f32.mrf.mxu0  ;;  %3045 = vmatprep.mubr.bf16.mxu0 %v2612_v1  ;;  %v2568_v42 = vmax.f32 %v2497_v51, 0.0 }
 0x397   : > { %v2391_v25 = vpop.f32.mrf.mxu1  ;;  %3046 = vmatmul.mubr.bf16.gmra.mxu0 %v2611_v5 }
 0x398   : > { %v2501_v26 = vadd.f32 %v2500_v22, %v2388_v48  ;;  %v2504_v10 = vpop.f32.mrf.mxu0  ;;  %v2571_v11 = vmax.f32 %v2499_v47, 0.0  ;;  %v2392_v6 = vadd.f32 %v2391_v25, %v4979_v8 }
 0x399   : > { %v2393_v41 = vpop.f32.mrf.mxu1 }
 0x39a   : > { %v2572_v12 = vmax.f32 %v2501_v26, 0.0  ;;  %v2394_v14 = vadd.f32 %v2393_v41, %v4974_v61  ;;  %v2506_v63 = vpop.f32.mrf.mxu0  ;;  %v2615_v13 = vpack.c.bf16 %v2571_v11, %v2567_v2  ;;  %v2505_v52 = vadd.f32 %v2504_v10, %v2392_v6 }
 0x39b   : > { %v2395_v7 = vpop.f32.mrf.mxu1 }
 0x39c   : > { %v2616_v60 = vpack.c.bf16 %v2572_v12, %v2568_v42  ;;  %v2396_v3 = vadd.f32 %v2395_v7, %v4979_v8  ;;  %v2508_v44 = vpop.f32.mrf.mxu0  ;;  %v2507_v17 = vadd.f32 %v2506_v63, %v2394_v14  ;;  %v2575_v38 = vmax.f32 %v2505_v52, 0.0 }
 0x39d   : > { %v2397_v16 = vpop.f32.mrf.mxu1 }
 0x39e   : > { %v2509_v49 = vadd.f32 %v2508_v44, %v2396_v3  ;;  %v2398_v43 = vadd.f32 %v2397_v16, %v4974_v61  ;;  %v2510_v50 = vpop.f32.mrf.mxu0  ;;  %3053 = vmatprep.mubr.bf16.mxu0 %v2616_v60  ;;  %v2576_v27 = vmax.f32 %v2507_v17, 0.0 }
 0x39f   : > { %v2401_v53 = vpop.f32.mrf.mxu1  ;;  %3054 = vmatmul.mubr.bf16.gmra.mxu0 %v2615_v13 }
 0x3a0   : > { %v2511_v37 = vadd.f32 %v2510_v50, %v2398_v43  ;;  %v2514_v29 = vpop.f32.mrf.mxu0  ;;  %v2579_v15 = vmax.f32 %v2509_v49, 0.0  ;;  %v2402_v46 = vadd.f32 %v2401_v53, %v4979_v8 }
 0x3a1   : > { %v2403_v35 = vpop.f32.mrf.mxu1 }
 0x3a2   : > { %v2580_v31 = vmax.f32 %v2511_v37, 0.0  ;;  %v2404_v18 = vadd.f32 %v2403_v35, %v4974_v61  ;;  %v2516_v36 = vpop.f32.mrf.mxu0  ;;  %v2619_v30 = vpack.c.bf16 %v2579_v15, %v2575_v38  ;;  %v2515_v19 = vadd.f32 %v2514_v29, %v2402_v46 }
 0x3a3   : > { %v2405_v28 = vpop.f32.mrf.mxu1 }
 0x3a4   : > { %v2620_v54 = vpack.c.bf16 %v2580_v31, %v2576_v27  ;;  %v2406_v55 = vadd.f32 %v2405_v28, %v4979_v8  ;;  %v2518_v56 = vpop.f32.mrf.mxu0  ;;  %v2517_v58 = vadd.f32 %v2516_v36, %v2404_v18  ;;  %v2583_v40 = vmax.f32 %v2515_v19, 0.0  ;;  %v5018_v27 = vld [vmem:[%s5094_s10] ss:$0 sm:$0xff] }
 0x3a5   : > { %v2407_v57 = vpop.f32.mrf.mxu1 }
 0x3a6   : > { %v2519_v59 = vadd.f32 %v2518_v56, %v2406_v55  ;;  %v2408_v62 = vadd.f32 %v2407_v57, %v4974_v61  ;;  %v2520_v9 = vpop.f32.mrf.mxu0  ;;  %3061 = vmatprep.mubr.bf16.mxu0 %v2620_v54  ;;  %v2584_v34 = vmax.f32 %v2517_v58, 0.0 }
 0x3a7   : > { %v2411_v20 = vpop.f32.mrf.mxu1  ;;  %3062 = vmatmul.mubr.bf16.gmra.mxu0 %v2619_v30 }
 0x3a8   : > { %v2521_v21 = vadd.f32 %v2520_v9, %v2408_v62  ;;  %v2524_v24 = vpop.f32.mrf.mxu0  ;;  %v2587_v32 = vmax.f32 %v2519_v59, 0.0  ;;  %v2412_v4 = vadd.f32 %v2411_v20, %v4979_v8 }
 0x3a9   : > { %v2413_v33 = vpop.f32.mrf.mxu1 }
 0x3aa   : > { %v2588_v0 = vmax.f32 %v2521_v21, 0.0  ;;  %v2414_v39 = vadd.f32 %v2413_v33, %v4974_v61  ;;  %v2526_v1 = vpop.f32.mrf.mxu0  ;;  %v2623_v48 = vpack.c.bf16 %v2587_v32, %v2583_v40  ;;  %v2525_v10 = vadd.f32 %v2524_v24, %v2412_v4 }
 0x3ab   : > { %v2415_v5 = vpop.f32.mrf.mxu1 }
 0x3ac   : > { %v2624_v45 = vpack.c.bf16 %v2588_v0, %v2584_v34  ;;  %v2416_v51 = vadd.f32 %v2415_v5, %v4979_v8  ;;  %v2528_v47 = vpop.f32.mrf.mxu0  ;;  %v2527_v23 = vadd.f32 %v2526_v1, %v2414_v39  ;;  %v2591_v63 = vmax.f32 %v2525_v10, 0.0 }
 0x3ad   : > { %v2417_v22 = vpop.f32.mrf.mxu1 }
 0x3ae   : > { %v2529_v25 = vadd.f32 %v2528_v47, %v2416_v51  ;;  %v2418_v26 = vadd.f32 %v2417_v22, %v4974_v61  ;;  %3069 = vmatprep.mubr.bf16.mxu0 %v2624_v45  ;;  %v2530_v11 = vpop.f32.mrf.mxu0  ;;  %v2592_v12 = vmax.f32 %v2527_v23, 0.0 }
 0x3af   : > { %3070 = vmatmul.mubr.bf16.gmra.mxu0 %v2623_v48 }
 0x3b0   : > { %v2531_v41 = vadd.f32 %v2530_v11, %v2418_v26  ;;  %v2595_v42 = vmax.f32 %v2529_v25, 0.0 }
 0x3b2   : > { %v2596_v14 = vmax.f32 %v2531_v41, 0.0  ;;  %v2627_v6 = vpack.c.bf16 %v2595_v42, %v2591_v63 }
 0x3b4   : > { %v2628_v2 = vpack.c.bf16 %v2596_v14, %v2592_v12 }
 0x3b6   : > { %3077 = vmatprep.mubr.bf16.mxu0 %v2628_v2 }
 0x3b7   : > { %3078 = vmatmul.mubr.bf16.gmra.mxu0 %v2627_v6 }
 0x3ff   : > { %v3522_v8 = vpop.f32.mrf.mxu1 }
 0x401   : > { %v3523_v7 = vpop.f32.mrf.mxu1 }
 0x402   : > { %v3524_v35 = vadd.f32 %v3523_v7, %v3522_v8 }
 0x403   : > { %v3525_v60 = vpop.f32.mrf.mxu1 }
 0x404   : > { %v2927_v38 = vadd.f32 %v3524_v35, %v5018_v27 }
 0x405   : > { %v3526_v3 = vpop.f32.mrf.mxu1 }
 0x406   : > { %v3527_v46 = vadd.f32 %v3526_v3, %v3525_v60 }
 0x407   : > { %v3528_v44 = vpop.f32.mrf.mxu1 }
 0x408   : > { %v2930_v57 = vadd.f32 %v3527_v46, %v5018_v27 }
 0x409   : > { %v3529_v13 = vpop.f32.mrf.mxu1 }
 0x40a   : > { %v3530_v58 = vadd.f32 %v3529_v13, %v3528_v44 }
 0x40b   : > { %v3531_v61 = vpop.f32.mrf.mxu1 }
 0x40c   : > { %v2935_v24 = vadd.f32 %v3530_v58, %v5018_v27 }
 0x40d   : > { %v3532_v16 = vpop.f32.mrf.mxu1 }
 0x40e   : > { %v3533_v32 = vadd.f32 %v3532_v16, %v3531_v61 }
 0x40f   : > { %v3534_v17 = vpop.f32.mrf.mxu1 }
 0x410   : > { %v2938_v4 = vadd.f32 %v3533_v32, %v5018_v27 }
 0x411   : > { %v3535_v49 = vpop.f32.mrf.mxu1 }
 0x412   : > { %v3536_v5 = vadd.f32 %v3535_v49, %v3534_v17 }
 0x413   : > { %v3537_v43 = vpop.f32.mrf.mxu1 }
 0x414   : > { %v2943_v25 = vadd.f32 %v3536_v5, %v5018_v27 }
 0x415   : > { %v3538_v50 = vpop.f32.mrf.mxu1 }
 0x416   : > { %v3539_v26 = vadd.f32 %v3538_v50, %v3537_v43 }
 0x417   : > { %v3540_v52 = vpop.f32.mrf.mxu1 }
 0x418   : > { %v2946_v63 = vadd.f32 %v3539_v26, %v5018_v27 }
 0x419   : > { %v3541_v53 = vpop.f32.mrf.mxu1 }
 0x41a   : > { %v3542_v2 = vadd.f32 %v3541_v53, %v3540_v52 }
 0x41b   : > { %v3543_v37 = vpop.f32.mrf.mxu1 }
 0x41c   : > { %v2951_v13 = vadd.f32 %v3542_v2, %v5018_v27 }
 0x41d   : > { %v3544_v29 = vpop.f32.mrf.mxu1 }
 0x41e   : > { %v3545_v61 = vadd.f32 %v3544_v29, %v3543_v37 }
 0x41f   : > { %v5013_v15 = vpop.f32.mrf.mxu1 }
 0x420   : > { %v2954_v53 = vadd.f32 %v3545_v61, %v5018_v27 }
 0x421   : > { %v5020_v31 = vpop.f32.mrf.mxu1 }
 0x422   : > { %v3548_v35 = vadd.f32 %v5020_v31, %v5013_v15 }
 0x423   : > { %v5023_v54 = vpop.f32.mrf.mxu1 }
 0x425   : > { %v3550_v9 = vpop.f32.mrf.mxu1 }
 0x427   : > { %v3552_v0 = vpop.f32.mrf.mxu1 }
 0x429   : > { %v3553_v47 = vpop.f32.mrf.mxu1 }
 0x42b   : > { %v3555_v41 = vpop.f32.mrf.mxu1 }
 0x42d   : > { %v3556_v7 = vpop.f32.mrf.mxu1 }
 0x42f   : > { %v3558_v49 = vpop.f32.mrf.mxu1 }
 0x43f   : > { %v3586_v18 = vpop.f32.mrf.mxu0 }
 0x441   : > { %v3587_v36 = vpop.f32.mrf.mxu0 }
 0x442   : > { %v3588_v28 = vadd.f32 %v3587_v36, %v3586_v18 }
 0x443   : > { %v3589_v55 = vpop.f32.mrf.mxu0 }
 0x444   : > { %v3024_v56 = vadd.f32 %v3588_v28, %v2927_v38  ;;  %v3559_v38 = vpop.f32.mrf.mxu1  ;;  %v2959_v28 = vadd.f32 %v3548_v35, %v5018_v27 }
 0x445   : > { %v3590_v30 = vpop.f32.mrf.mxu0 }
 0x446   : > { %v3086_v59 = vsel %vm457_vm1, %v3024_v56, 0.0  ;;  %v3591_v62 = vadd.f32 %v3590_v30, %v3589_v55  ;;  %v3551_v55 = vadd.f32 %v3550_v9, %v5023_v54 }
 0x447   : > { %3102 = vst [vmem:[%s5029_s23] sm:$0xff] %v3086_v59  ;;  %v3592_v19 = vpop.f32.mrf.mxu0 }
 0x448   : > { %v3027_v20 = vadd.f32 %v3591_v62, %v2930_v57  ;;  %v3561_v57 = vpop.f32.mrf.mxu1  ;;  %v2962_v59 = vadd.f32 %v3551_v55, %v5018_v27  ;;  %v3554_v62 = vadd.f32 %v3553_v47, %v3552_v0 }
 0x449   : > { %v3593_v21 = vpop.f32.mrf.mxu0 }
 0x44a   : > { %v3087_v33 = vsel %vm457_vm1, %v3027_v20, 0.0  ;;  %v3594_v34 = vadd.f32 %v3593_v21, %v3592_v19  ;;  %v3562_v21 = vpop.f32.mrf.mxu1  ;;  %v2967_v9 = vadd.f32 %v3554_v62, %v5018_v27 }
 0x44b   : > { %3103 = vst [vmem:[%s5029_s23 + $0x8] sm:$0xff] %v3087_v33  ;;  %v3595_v39 = vpop.f32.mrf.mxu0  ;;  %v3557_v33 = vadd.f32 %v3556_v7, %v3555_v41 }
 0x44c   : > { %v3032_v1 = vadd.f32 %v3594_v34, %v2935_v24 }
 0x44d   : > { %v3596_v40 = vpop.f32.mrf.mxu0  ;;  %v2970_v5 = vadd.f32 %v3557_v33, %v5018_v27 }
 0x44e   : > { %v3088_v45 = vsel %vm457_vm1, %v3032_v1, 0.0  ;;  %v3597_v51 = vadd.f32 %v3596_v40, %v3595_v39  ;;  %v3564_v1 = vpop.f32.mrf.mxu1 }
 0x44f   : > { %3104 = vst [vmem:[%s5029_s23 + $0x10] sm:$0xff] %v3088_v45  ;;  %v3598_v48 = vpop.f32.mrf.mxu0  ;;  %v3560_v45 = vadd.f32 %v3559_v38, %v3558_v49 }
 0x450   : > { %v3035_v22 = vadd.f32 %v3597_v51, %v2938_v4 }
 0x451   : > { %v3599_v23 = vpop.f32.mrf.mxu0  ;;  %v2975_v26 = vadd.f32 %v3560_v45, %v5018_v27 }
 0x452   : > { %v3089_v10 = vsel %vm457_vm1, %v3035_v22, 0.0  ;;  %v3600_v11 = vadd.f32 %v3599_v23, %v3598_v48  ;;  %v3565_v48 = vpop.f32.mrf.mxu1 }
 0x453   : > { %3105 = vst [vmem:[%s5029_s23 + $0x18] sm:$0xff] %v3089_v10  ;;  %v3601_v42 = vpop.f32.mrf.mxu0  ;;  %v3563_v10 = vadd.f32 %v3562_v21, %v3561_v57 }
 0x454   : > { %v3040_v12 = vadd.f32 %v3600_v11, %v2943_v25 }
 0x455   : > { %v3602_v14 = vpop.f32.mrf.mxu0  ;;  %v2978_v2 = vadd.f32 %v3563_v10, %v5018_v27 }
 0x456   : > { %v3090_v6 = vsel %vm457_vm1, %v3040_v12, 0.0  ;;  %v3603_v8 = vadd.f32 %v3602_v14, %v3601_v42  ;;  %v3567_v42 = vpop.f32.mrf.mxu1 }
 0x457   : > { %3106 = vst [vmem:[%s5029_s23 + $0x20] sm:$0xff] %v3090_v6  ;;  %v3604_v60 = vpop.f32.mrf.mxu0  ;;  %v3566_v6 = vadd.f32 %v3565_v48, %v3564_v1 }
 0x458   : > { %v3043_v3 = vadd.f32 %v3603_v8, %v2946_v63 }
 0x459   : > { %v3605_v44 = vpop.f32.mrf.mxu0  ;;  %v2983_v61 = vadd.f32 %v3566_v6, %v5018_v27 }
 0x45a   : > { %v3091_v16 = vsel %vm457_vm1, %v3043_v3, 0.0  ;;  %v3606_v17 = vadd.f32 %v3605_v44, %v3604_v60  ;;  %v3568_v60 = vpop.f32.mrf.mxu1 }
 0x45b   : > { %3107 = vst [vmem:[%s5029_s23 + $0x28] sm:$0xff] %v3091_v16  ;;  %v3607_v43 = vpop.f32.mrf.mxu0  ;;  %v3569_v16 = vadd.f32 %v3568_v60, %v3567_v42 }
 0x45c   : > { %v3048_v50 = vadd.f32 %v3606_v17, %v2951_v13 }
 0x45d   : > { %v3608_v52 = vpop.f32.mrf.mxu0 }
 0x45e   : > { %v3092_v18 = vsel %vm457_vm1, %v3048_v50, 0.0  ;;  %v3609_v36 = vadd.f32 %v3608_v52, %v3607_v43 }
 0x45f   : > { %3108 = vst [vmem:[%s5029_s23 + $0x30] sm:$0xff] %v3092_v18  ;;  %v3610_v37 = vpop.f32.mrf.mxu0 }
 0x460   : > { %v3051_v29 = vadd.f32 %v3609_v36, %v2954_v53  ;;  %v2986_v53 = vadd.f32 %v3569_v16, %v5018_v27 }
 0x461   : > { %v3611_v46 = vpop.f32.mrf.mxu0 }
 0x462   : > { %v3093_v56 = vsel %vm457_vm1, %v3051_v29, 0.0  ;;  %v3612_v30 = vadd.f32 %v3611_v46, %v3610_v37 }
 0x463   : > { %3109 = vst [vmem:[%s5029_s23 + $0x38] sm:$0xff] %v3093_v56  ;;  %v3613_v58 = vpop.f32.mrf.mxu0 }
 0x464   : > { %v3056_v15 = vadd.f32 %v3612_v30, %v2959_v28 }
 0x465   : > { %v3614_v31 = vpop.f32.mrf.mxu0 }
 0x466   : > { %v3094_v19 = vsel %vm457_vm1, %v3056_v15, 0.0  ;;  %v3615_v20 = vadd.f32 %v3614_v31, %v3613_v58 }
 0x467   : > { %3110 = vst [vmem:[%s5029_s23 + $0x40] sm:$0xff] %v3094_v19  ;;  %v3616_v24 = vpop.f32.mrf.mxu0 }
 0x468   : > { %v3059_v32 = vadd.f32 %v3615_v20, %v2962_v59 }
 0x469   : > { %v3617_v54 = vpop.f32.mrf.mxu0 }
 0x46a   : > { %v3095_v34 = vsel %vm457_vm1, %v3059_v32, 0.0  ;;  %v3618_v39 = vadd.f32 %v3617_v54, %v3616_v24 }
 0x46b   : > { %3111 = vst [vmem:[%s5029_s23 + $0x48] sm:$0xff] %v3095_v34  ;;  %v3619_v40 = vpop.f32.mrf.mxu0 }
 0x46c   : > { %v3064_v4 = vadd.f32 %v3618_v39, %v2967_v9 }
 0x46d   : > { %v3620_v0 = vpop.f32.mrf.mxu0 }
 0x46e   : > { %v3096_v51 = vsel %vm457_vm1, %v3064_v4, 0.0  ;;  %v3621_v47 = vadd.f32 %v3620_v0, %v3619_v40 }
 0x46f   : > { %3112 = vst [vmem:[%s5029_s23 + $0x50] sm:$0xff] %v3096_v51  ;;  %v3622_v22 = vpop.f32.mrf.mxu0 }
 0x470   : > { %v3067_v23 = vadd.f32 %v3621_v47, %v2970_v5 }
 0x471   : > { %v3623_v25 = vpop.f32.mrf.mxu0 }
 0x472   : > { %v3097_v11 = vsel %vm457_vm1, %v3067_v23, 0.0  ;;  %v3624_v41 = vadd.f32 %v3623_v25, %v3622_v22 }
 0x473   : > { %3113 = vst [vmem:[%s5029_s23 + $0x58] sm:$0xff] %v3097_v11  ;;  %v3625_v12 = vpop.f32.mrf.mxu0 }
 0x474   : > { %v3072_v14 = vadd.f32 %v3624_v41, %v2975_v26 }
 0x475   : > { %v3626_v63 = vpop.f32.mrf.mxu0 }
 0x476   : > { %v3098_v8 = vsel %vm457_vm1, %v3072_v14, 0.0  ;;  %v3627_v7 = vadd.f32 %v3626_v63, %v3625_v12 }
 0x477   : > { %3114 = vst [vmem:[%s5029_s23 + $0x60] sm:$0xff] %v3098_v8  ;;  %v3628_v3 = vpop.f32.mrf.mxu0 }
 0x478   : > { %v3075_v44 = vadd.f32 %v3627_v7, %v2978_v2 }
 0x479   : > { %v3629_v13 = vpop.f32.mrf.mxu0 }
 0x47a   : > { %v3099_v17 = vsel %vm457_vm1, %v3075_v44, 0.0  ;;  %v3630_v49 = vadd.f32 %v3629_v13, %v3628_v3 }
 0x47b   : > { %3115 = vst [vmem:[%s5029_s23 + $0x68] sm:$0xff] %v3099_v17  ;;  %v3631_v43 = vpop.f32.mrf.mxu0 }
 0x47c   : > { %v3080_v50 = vadd.f32 %v3630_v49, %v2983_v61 }
 0x47d   : > { %v3632_v52 = vpop.f32.mrf.mxu0 }
 0x47e   : > { %v3100_v35 = vsel %vm457_vm1, %v3080_v50, 0.0  ;;  %v3633_v18 = vadd.f32 %v3632_v52, %v3631_v43 }
 0x47f   : > { %3116 = vst [vmem:[%s5029_s23 + $0x70] sm:$0xff] %v3100_v35 }
 0x480   : > { %v3083_v36 = vadd.f32 %v3633_v18, %v2986_v53 }
 0x482   : > { %v3101_v38 = vsel %vm457_vm1, %v3083_v36, 0.0 }
 0x483   : > { %3117 = vst [vmem:[%s5029_s23 + $0x78] sm:$0xff] %v3101_v38 }
 0x484 PF: > { %s23_s21 = sadd.s32 1, %s3931_s21  }
 0x485   : > { %p20_p4 = scmp.ge.s32.totalorder %s23_s21, 4  }
 0x487   :  { %22 = sbr.rel (!%p20_p4) target bundleno = 1 (0x1), region = 106 }

</bundles_post_ra>
